<compile_context>
chip_gen: v7x
topology: tpu7x:2x2x1
jax: 0.10.0
libtpu: 0.0.40
codegen_flags: <defaults>
</compile_context>

<pallas_src>
import jax
import jax.numpy as jnp
from jax import lax
from jax.experimental import pallas as pl
from jax.experimental.pallas import tpu as pltpu

IN_FEATURES = 16 * 16      # 256
HIDDEN = 64 * 64           # 4096
MID = 4 * 4                # 16
OUT_FEATURES = 10

CHUNK = 1024               # in-kernel fc1/fc2 fusion chunk along the hidden dim
K_STREAM_BLOCK = 1024      # grid-streamed w1 block when there is 1 batch tile


def _round_up(n, m):
    return (n + m - 1) // m * m


def _mlp_kernel(x_ref, w1_ref, b1_ref, w2_ref, b2_ref, w3_ref, b3_ref,
                o_ref, acc_ref):
    k = pl.program_id(1)

    @pl.when(k == 0)
    def _init():
        acc_ref[...] = jnp.zeros_like(acc_ref)

    tb = x_ref.shape[0]
    # Cast activations to bf16 once per grid step; fc1/fc2 run as native bf16
    # MXU matmuls with f32 accumulation.
    x = x_ref[...].astype(jnp.bfloat16)                        # (tb, 256)

    kb = w1_ref.shape[1]                                       # hidden block width
    chunk = min(CHUNK, kb)
    n_inner = kb // chunk

    def body(c, acc):
        off = pl.multiple_of(c * chunk, 128)
        w1_c = w1_ref[:, pl.ds(off, chunk)]                    # (256, chunk) bf16
        h1 = jnp.dot(x, w1_c, preferred_element_type=jnp.float32)
        h1 = jnp.maximum(h1 + b1_ref[:, pl.ds(off, chunk)], 0.0)   # f32 bias+ReLU
        w2_c = w2_ref[pl.ds(off, chunk), :]                    # (chunk, 16) bf16
        return acc + jnp.dot(h1.astype(jnp.bfloat16), w2_c,
                             preferred_element_type=jnp.float32)

    # fc2 partials carried in registers; single VMEM RMW per grid step.
    part = lax.fori_loop(0, n_inner, body,
                         jnp.zeros((tb, MID), jnp.float32), unroll=True)
    acc_ref[...] += part

    @pl.when(k == pl.num_programs(1) - 1)
    def _finalize():
        h2 = jnp.maximum(acc_ref[...] + b2_ref[...], 0.0)      # (tb, 16) f32
        out = jnp.dot(h2, w3_ref[...], preferred_element_type=jnp.float32)
        o_ref[...] = (out + b3_ref[...]).astype(o_ref.dtype)   # (tb, 10)


def digitos_forward(x, params, *, tile_b=512):
    """x: (B, 256) float32. params: PyTorch-layout fc{1,2,3} weights/biases."""
    B, F = x.shape
    assert F == IN_FEATURES

    # Glue: transpose (out,in) -> (in,out); big weights stored bf16 in HBM
    # (halves the bandwidth-limiting transfer); biases as (1, out) rows for
    # sublane broadcast; fc3 stays f32 (tiny).
    w1 = params["w1"].T.astype(jnp.bfloat16)   # (256, 4096)
    w2 = params["w2"].T.astype(jnp.bfloat16)   # (4096, 16)
    w3 = params["w3"].T                        # (16, 10) f32
    b1 = params["b1"][None, :]                 # (1, 4096) f32
    b2 = params["b2"][None, :]                 # (1, 16)   f32
    b3 = params["b3"][None, :]                 # (1, 10)   f32

    # ---- batch tiling ----
    if B > tile_b:
        tb = tile_b                            # many tiles; w1 stays resident
    elif B >= 64:
        tb = _round_up(-(-B // 2), 8)          # split in 2 -> both v7x TCs engage
    else:
        tb = _round_up(B, 8)                   # single tile: latency path
    Bp = _round_up(B, tb)
    n_b = Bp // tb
    xp = x if Bp == B else jnp.pad(x, ((0, Bp - B), (0, 0)))

    # ---- hidden (reduction) axis: stream w1 only when there is one batch
    # tile (otherwise it would be re-fetched per tile); else resident.
    kb = K_STREAM_BLOCK if n_b == 1 else HIDDEN
    n_k = HIDDEN // kb
    grid = (n_b, n_k)

    const2 = lambda i, k: (0, 0)
    out = pl.pallas_call(
        _mlp_kernel,
        out_shape=jax.ShapeDtypeStruct((Bp, OUT_FEATURES), jnp.float32),
        grid_spec=pltpu.PrefetchScalarGridSpec(
            num_scalar_prefetch=0,
            grid=grid,
            in_specs=[
                pl.BlockSpec((tb, IN_FEATURES), lambda i, k: (i, 0)),  # x
                pl.BlockSpec((IN_FEATURES, kb), lambda i, k: (0, k)),  # w1
                pl.BlockSpec((1, kb), lambda i, k: (0, k)),            # b1
                pl.BlockSpec((kb, MID), lambda i, k: (k, 0)),          # w2
                pl.BlockSpec((1, MID), const2),                        # b2
                pl.BlockSpec((MID, OUT_FEATURES), const2),             # w3
                pl.BlockSpec((1, OUT_FEATURES), const2),               # b3
            ],
            out_specs=pl.BlockSpec((tb, OUT_FEATURES), lambda i, k: (i, 0)),
            scratch_shapes=[pltpu.VMEM((tb, MID), jnp.float32)],       # fc2 acc
        ),
        compiler_params=pltpu.CompilerParams(
            # batch axis splits across v7x's 2 TCs; hidden axis is a reduction.
            dimension_semantics=("parallel", "arbitrary"),
            vmem_limit_bytes=32 << 20,
        ),
    )(xp, w1, b1, w2, b2, w3, b3)
    return out[:B] if Bp != B else out


def init_params(key):
    """Deterministic init mimicking nn.Linear default (uniform(-1/sqrt(fan_in), +))."""
    dims = [(HIDDEN, IN_FEATURES), (MID, HIDDEN), (OUT_FEATURES, MID)]  # (out, in)
    params = {}
    for i, (out_f, in_f) in enumerate(dims, start=1):
        key, kw, kb = jax.random.split(key, 3)
        bound = 1.0 / (in_f ** 0.5)
        params[f"w{i}"] = jax.random.uniform(
            kw, (out_f, in_f), jnp.float32, minval=-bound, maxval=bound)
        params[f"b{i}"] = jax.random.uniform(
            kb, (out_f,), jnp.float32, minval=-bound, maxval=bound)
    return params


def _reference(x, params):
    h = jnp.maximum(x @ params["w1"].T + params["b1"], 0.0)
    h = jnp.maximum(h @ params["w2"].T + params["b2"], 0.0)
    return h @ params["w3"].T + params["b3"]


if __name__ == "__main__":
    key = jax.random.PRNGKey(0)
    key, kx, kx2 = jax.random.split(key, 3)
    params = init_params(key)

    # Small batch: exercises the single-tile / streamed-w1 (latency) path.
    x = jax.random.normal(kx, (8, IN_FEATURES), jnp.float32)
    out = jax.block_until_ready(digitos_forward(x, params))
    ref = _reference(x, params)
    assert out.shape == (8, OUT_FEATURES)
    # bf16 weights + bf16 activations on the two big layers -> relaxed tolerance.
    assert jnp.allclose(out, ref, atol=2e-2, rtol=2e-2), float(
        jnp.max(jnp.abs(out - ref)))

    # Mid batch: exercises the 2-batch-tile / resident-w1 path.
    x2 = jax.random.normal(kx2, (96, IN_FEATURES), jnp.float32)
    out2 = jax.block_until_ready(digitos_forward(x2, params))
    ref2 = _reference(x2, params)
    assert out2.shape == (96, OUT_FEATURES)
    assert jnp.allclose(out2, ref2, atol=2e-2, rtol=2e-2), float(
        jnp.max(jnp.abs(out2 - ref2)))

    print("KERNEL_OK")
</pallas_src>

<mosaic_0001>
module attributes {stable_mosaic.version = 11 : i64} {
  func.func @_mlp_kernel(%arg0: i32, %arg1: i32, %arg2: memref<8x256xf32, #tpu.memory_space<vmem>>, %arg3: memref<256x1024xbf16, #tpu.memory_space<vmem>>, %arg4: memref<1x1024xf32, #tpu.memory_space<vmem>>, %arg5: memref<1024x16xbf16, #tpu.memory_space<vmem>>, %arg6: memref<1x16xf32, #tpu.memory_space<vmem>>, %arg7: memref<16x10xf32, #tpu.memory_space<vmem>>, %arg8: memref<1x10xf32, #tpu.memory_space<vmem>>, %arg9: memref<8x10xf32, #tpu.memory_space<vmem>>, %arg10: memref<8x16xf32, #tpu.memory_space<vmem>>) attributes {dimension_semantics = [#tpu.dimension_semantics<parallel>, #tpu.dimension_semantics<arbitrary>], iteration_bounds = array<i64: 1, 4>, scalar_prefetch = 0 : i64, scratch_operands = 1 : i64, tpu.core_type = #tpu.core_type<tc>, window_params = [{transform_indices = @transform_0, window_bounds = array<i64: 8, 256>}, {transform_indices = @transform_1, window_bounds = array<i64: 256, 1024>}, {transform_indices = @transform_2, window_bounds = array<i64: 1, 1024>}, {transform_indices = @transform_3, window_bounds = array<i64: 1024, 16>}, {pipeline_mode = #tpu.pipeline_mode<synchronous>, transform_indices = @transform_4, window_bounds = array<i64: 1, 16>}, {pipeline_mode = #tpu.pipeline_mode<synchronous>, transform_indices = @transform_5, window_bounds = array<i64: 16, 10>}, {pipeline_mode = #tpu.pipeline_mode<synchronous>, transform_indices = @transform_6, window_bounds = array<i64: 1, 10>}, {transform_indices = @transform_7, window_bounds = array<i64: 8, 10>}]} {
    %c0_i32 = arith.constant 0 : i32
    %0 = arith.cmpi eq, %arg1, %c0_i32 : i32
    %1 = arith.extui %0 : i1 to i32
    %c0_i32_0 = arith.constant 0 : i32
    %2 = arith.cmpi ne, %1, %c0_i32_0 : i32
    scf.if %2 {
      %cst_14 = arith.constant 0.000000e+00 : f32
      %28 = vector.broadcast %cst_14 : f32 to vector<8x16xf32>
      %c0_15 = arith.constant 0 : index
      %c0_16 = arith.constant 0 : index
      %29 = vector.load %arg10[%c0_15, %c0_16] : memref<8x16xf32, #tpu.memory_space<vmem>>, vector<8x16xf32>
      tpu.vector_store %arg10[%c0_15, %c0_16], %28 {strides = array<i32>} : memref<8x16xf32, #tpu.memory_space<vmem>>, vector<8x16xf32>,
    } else {
    }
    %c0 = arith.constant 0 : index
    %c0_1 = arith.constant 0 : index
    %3 = vector.load %arg2[%c0, %c0_1] : memref<8x256xf32, #tpu.memory_space<vmem>>, vector<8x256xf32>
    %4 = arith.truncf %3 : vector<8x256xf32> to vector<8x256xbf16>
    %cst = arith.constant 0.000000e+00 : f32
    %5 = vector.broadcast %cst : f32 to vector<8x16xf32>
    %c0_i32_2 = arith.constant 0 : i32
    %c1024_i32 = arith.constant 1024 : i32
    %6 = arith.muli %c0_i32_2, %c1024_i32 : i32
    %7 = tpu.assume_multiple %6, 128 : i32
    %c0_3 = arith.constant 0 : index
    %8 = arith.index_cast %7 : i32 to index
    %9 = vector.load %arg3[%c0_3, %8] : memref<256x1024xbf16, #tpu.memory_space<vmem>>, vector<256x1024xbf16>
    %cst_4 = arith.constant dense<0.000000e+00> : vector<8x1024xf32>
    %10 = tpu.matmul %4, %9, %cst_4 {dimension_numbers = #tpu.dot_dimension_numbers<[1], [0], [0], [1], [0, 0, 1, 1], [], []>} : vector<8x256xbf16>, vector<256x1024xbf16>, vector<8x1024xf32> -> vector<8x1024xf32>
    %c0_5 = arith.constant 0 : index
    %11 = arith.index_cast %7 : i32 to index
    %12 = vector.load %arg4[%c0_5, %11] : memref<1x1024xf32, #tpu.memory_space<vmem>>, vector<1x1024xf32>
    %13 = vector.broadcast %12 : vector<1x1024xf32> to vector<8x1024xf32>
    %14 = arith.addf %10, %13 : vector<8x1024xf32>
    %cst_6 = arith.constant 0.000000e+00 : f32
    %15 = vector.broadcast %cst_6 : f32 to vector<8x1024xf32>
    %16 = arith.maximumf %14, %15 : vector<8x1024xf32>
    %17 = arith.index_cast %7 : i32 to index
    %c0_7 = arith.constant 0 : index
    %18 = vector.load %arg5[%17, %c0_7] : memref<1024x16xbf16, #tpu.memory_space<vmem>>, vector<1024x16xbf16>
    %19 = arith.truncf %16 : vector<8x1024xf32> to vector<8x1024xbf16>
    %cst_8 = arith.constant dense<0.000000e+00> : vector<8x16xf32>
    %20 = tpu.matmul %19, %18, %cst_8 {dimension_numbers = #tpu.dot_dimension_numbers<[1], [0], [0], [1], [0, 0, 1, 1], [], []>} : vector<8x1024xbf16>, vector<1024x16xbf16>, vector<8x16xf32> -> vector<8x16xf32>
    %21 = arith.addf %5, %20 : vector<8x16xf32>
    %c1_i32 = arith.constant 1 : i32
    %c0_9 = arith.constant 0 : index
    %c0_10 = arith.constant 0 : index
    %22 = vector.load %arg10[%c0_9, %c0_10] : memref<8x16xf32, #tpu.memory_space<vmem>>, vector<8x16xf32>
    %23 = arith.addf %22, %21 : vector<8x16xf32>
    %c0_11 = arith.constant 0 : index
    %c0_12 = arith.constant 0 : index
    %24 = vector.load %arg10[%c0_11, %c0_12] : memref<8x16xf32, #tpu.memory_space<vmem>>, vector<8x16xf32>
    tpu.vector_store %arg10[%c0_11, %c0_12], %23 {strides = array<i32>} : memref<8x16xf32, #tpu.memory_space<vmem>>, vector<8x16xf32>,
    %c3_i32 = arith.constant 3 : i32
    %25 = arith.cmpi eq, %arg1, %c3_i32 : i32
    %26 = arith.extui %25 : i1 to i32
    %c0_i32_13 = arith.constant 0 : i32
    %27 = arith.cmpi ne, %26, %c0_i32_13 : i32
    scf.if %27 {
      %c0_14 = arith.constant 0 : index
      %c0_15 = arith.constant 0 : index
      %28 = vector.load %arg10[%c0_14, %c0_15] : memref<8x16xf32, #tpu.memory_space<vmem>>, vector<8x16xf32>
      %c0_16 = arith.constant 0 : index
      %c0_17 = arith.constant 0 : index
      %29 = vector.load %arg6[%c0_16, %c0_17] : memref<1x16xf32, #tpu.memory_space<vmem>>, vector<1x16xf32>
      %30 = vector.broadcast %29 : vector<1x16xf32> to vector<8x16xf32>
      %31 = arith.addf %28, %30 : vector<8x16xf32>
      %cst_18 = arith.constant 0.000000e+00 : f32
      %32 = vector.broadcast %cst_18 : f32 to vector<8x16xf32>
      %33 = arith.maximumf %31, %32 : vector<8x16xf32>
      %c0_19 = arith.constant 0 : index
      %c0_20 = arith.constant 0 : index
      %34 = vector.load %arg7[%c0_19, %c0_20] : memref<16x10xf32, #tpu.memory_space<vmem>>, vector<16x10xf32>
      %cst_21 = arith.constant dense<0.000000e+00> : vector<8x10xf32>
      %35 = tpu.matmul %33, %34, %cst_21 {dimension_numbers = #tpu.dot_dimension_numbers<[1], [0], [0], [1], [0, 0, 1, 1], [], []>} : vector<8x16xf32>, vector<16x10xf32>, vector<8x10xf32> -> vector<8x10xf32>
      %c0_22 = arith.constant 0 : index
      %c0_23 = arith.constant 0 : index
      %36 = vector.load %arg8[%c0_22, %c0_23] : memref<1x10xf32, #tpu.memory_space<vmem>>, vector<1x10xf32>
      %37 = vector.broadcast %36 : vector<1x10xf32> to vector<8x10xf32>
      %38 = arith.addf %35, %37 : vector<8x10xf32>
      %c0_24 = arith.constant 0 : index
      %c0_25 = arith.constant 0 : index
      %39 = vector.load %arg9[%c0_24, %c0_25] : memref<8x10xf32, #tpu.memory_space<vmem>>, vector<8x10xf32>
      tpu.vector_store %arg9[%c0_24, %c0_25], %38 {strides = array<i32>} : memref<8x10xf32, #tpu.memory_space<vmem>>, vector<8x10xf32>,
    } else {
    }
    return
  }
  func.func @transform_0(%arg0: i32, %arg1: i32) -> (i32, i32) {
    %c0_i32 = arith.constant 0 : i32
    %c0_i32_0 = arith.constant 0 : i32
    return %arg0, %c0_i32 : i32, i32
  }
  func.func @transform_1(%arg0: i32, %arg1: i32) -> (i32, i32) {
    %c0_i32 = arith.constant 0 : i32
    %c0_i32_0 = arith.constant 0 : i32
    return %c0_i32, %arg1 : i32, i32
  }
  func.func @transform_2(%arg0: i32, %arg1: i32) -> (i32, i32) {
    %c0_i32 = arith.constant 0 : i32
    %c0_i32_0 = arith.constant 0 : i32
    return %c0_i32, %arg1 : i32, i32
  }
  func.func @transform_3(%arg0: i32, %arg1: i32) -> (i32, i32) {
    %c0_i32 = arith.constant 0 : i32
    %c0_i32_0 = arith.constant 0 : i32
    return %arg1, %c0_i32 : i32, i32
  }
  func.func @transform_4(%arg0: i32, %arg1: i32) -> (i32, i32) {
    %c0_i32 = arith.constant 0 : i32
    %c0_i32_0 = arith.constant 0 : i32
    %c0_i32_1 = arith.constant 0 : i32
    return %c0_i32, %c0_i32_0 : i32, i32
  }
  func.func @transform_5(%arg0: i32, %arg1: i32) -> (i32, i32) {
    %c0_i32 = arith.constant 0 : i32
    %c0_i32_0 = arith.constant 0 : i32
    %c0_i32_1 = arith.constant 0 : i32
    return %c0_i32, %c0_i32_0 : i32, i32
  }
  func.func @transform_6(%arg0: i32, %arg1: i32) -> (i32, i32) {
    %c0_i32 = arith.constant 0 : i32
    %c0_i32_0 = arith.constant 0 : i32
    %c0_i32_1 = arith.constant 0 : i32
    return %c0_i32, %c0_i32_0 : i32, i32
  }
  func.func @transform_7(%arg0: i32, %arg1: i32) -> (i32, i32) {
    %c0_i32 = arith.constant 0 : i32
    %c0_i32_0 = arith.constant 0 : i32
    return %arg0, %c0_i32 : i32, i32
  }
}

</mosaic_0001>

<bundles_post_ra>
// kernel: tpu_custom_call.1
= control target key start
LH: loop header
LB: loop body
LE: loop exit
PB: predicated region body
PF: predicated region fallthrough
CT: control target
= control target key end

     0   :  { %s3697_s0 = inlined_call_operand.hbm [shape: f32[8,256], index: 0, kind: input, shape index: {}]   ;;  %s3698_s1 = inlined_call_operand.hbm [shape: bf16[256,4096], index: 1, kind: input, shape index: {}]   ;;  %s3699_s2 = inlined_call_operand.hbm [shape: f32[1,4096], index: 2, kind: input, shape index: {}]   ;;  %s3700_s3 = inlined_call_operand.vmem [shape: bf16[4096,16], index: 3, kind: input, shape index: {}]   ;;  %s3701_s4 = inlined_call_operand.hbm [shape: f32[1,16], index: 4, kind: input, shape index: {}]   ;;  %s3702_s5 = inlined_call_operand.hbm [shape: f32[16,10], index: 5, kind: input, shape index: {}]   ;;  %s3703_s6 = inlined_call_operand.hbm [shape: f32[1,10], index: 6, kind: input, shape index: {}]   ;;  %s3704_s7 = inlined_call_operand.hbm [shape: f32[8,10], index: 7, kind: output, shape index: {}]  }
   0x1   :  { %3717 = sst [smem:[#allocation23_spill]] %s3697_s0 }
   0x2   :  { %3718 = sst [smem:[#allocation24_spill]] %s3698_s1 }
   0x3   :  { %3719 = sst [smem:[#allocation25_spill]] %s3701_s4 }
   0x4   :  { %3720 = sst [smem:[#allocation26_spill]] %s3704_s7 }
   0x5   :  { %12 = vsyncpa [#allocation4], 0 }
   0x6   :  { %13 = vsyncpa [#allocation7], 0 }
   0x7   :  { %15 = vsyncpa [#allocation7 + $0x1], 0 }
   0x8   :  { %16 = vsyncpa [#allocation10], 0 }
   0x9   :  { %17 = vsyncpa [#allocation13], 0 }
   0xa   :  { %18 = vsyncpa [#allocation5], 0  ;;  %s3171_s24 = smov 0   ;;  %s3173_s25 = smov 0  }
   0xb   :  { %s3175_s26 = smov 0   ;;  %s3177_s27 = smov 0  }
   0xc   :  { %s3179_s28 = smov 0   ;;  %s3181_s29 = smov 0  }
   0xd LB: > { %3721 = sst [smem:[#allocation20_spill]] %s3113_s29  ;;  %s3200_s30 = sadd.s32 4294967295, %s3113_s29   ;;  %s3113_s29 = sphi %s3181_s29, %s24_s29   ;;  %s3109_s28 = sphi %s3179_s28, %s3756_s28   ;;  %s3105_s27 = sphi %s3177_s27, %s3755_s27   ;;  %s3101_s26 = sphi %s3175_s26, %s3754_s26   ;;  %s3097_s25 = sphi %s3173_s25, %s3753_s25   ;;  %s3093_s24 = sphi %s3171_s24, %s3752_s24  }
   0xe   : > { %p82_p0 = scmp.ne.s32.totalorder %s3097_s25, %s3093_s24  ;;  %p3705_p1 = scmp.eq.s32.totalorder %s3200_s30, 0 }
   0xf   : > { %p2343_p2 = scmp.ge.s32.totalorder %s3113_s29, 1  ;;  %p234_p3 = scmp.lt.s32.totalorder %s3113_s29, 5 }
  0x10   : > { %p3208_p4 = por %p3705_p1, %p82_p0  ;;  %s3115_s10 = smov [#allocation9]  }
  0x11   : > { %p3212_p5 = pnand %p2343_p2, %p234_p3  ;;  %s261_s11 = sshll.u32 %s3115_s10, 4  ;;  %s262_s11 = int_to_ptr.vmem [resolvable:$true] %s261_s11 }
  0x12   : > { %s3722_s8 = scalar_select %p3208_p4, 1, 0 }
  0x13   : > { %s3723_s9 = scalar_select %p3212_p5, 1, 0 }
  0x14   : > { %p2692_p6 = pneg %p3212_p5  ;;  %s33_s13 = sadd.s32 1, %s3109_s28 }
  0x15   : > { %s69_s14 = sadd.s32 1, %s3101_s26  ;;  %p3226_p8 = scmp.ge.s32.totalorder %s33_s13, 4 }
  0x16   : > { %p3220_p7 = pnand %p2692_p6, %p3705_p1  ;;  %s3726_s4 = sld [smem:[#allocation25_spill]] }
  0x17   : > { %s3725_s15 = scalar_select %p3226_p8, 1, 0 }
  0x18   : > { %s3724_s12 = scalar_select %p3220_p7, 1, 0 }
  0x19   : > { %p3238_p10 = pneg %p3220_p7 }
  0x1c   : > { %s2849_s18 = scalar_lea.hbm %s3726_s4, 16 }
  0x1d   : > { %p2850_p9 = scmp.ne.s32.totalorder %s3726_s4, %s2849_s18  ;;  %p2856_p13 = scmp.lt.u32.totalorder %s2849_s18, %s3726_s4 }
  0x1f   : > { %p2852_p11 = pnand %p3238_p10, %p2850_p9 }
  0x21   : > { %p2853_p12 = pneg %p2852_p11 }
  0x23   : > { %p2858_p0 = pnand %p2856_p13, %p2853_p12 }
  0x25   : > { %2861 = shalt.err (!%p2858_p0)
}
  0x26   : > { %s2862_s24 = scalar_lea.vmem %s262_s11, 16  ;;  %s2869_s10 = scalar_lea.vmem %s262_s11, 32 }
  0x27   : > { %p2863_p2 = scmp.ne.s32.totalorder %s262_s11, %s2862_s24  ;;  %p2870_p1 = scmp.lt.s32.totalorder %s262_s11, %s262_s11 }
  0x28   : > { %p2871_p4 = scmp.lt.s32.totalorder %s2869_s10, %s2862_s24 }
  0x29   : > { %p2865_p3 = pnand %p2863_p2, %p3238_p10 }
  0x2a   : > { %p2872_p5 = por %p2871_p4, %p2870_p1 }
  0x2b   : > { %p2866_p6 = pneg %p2865_p3 }
  0x2d   : > { %p2873_p8 = pnand %p2872_p5, %p2866_p6 }
  0x2f   : > { %2876 = shalt.err (!%p2873_p8)
}
  0x30   : > { %2698 = dma.hbm_to_vmem [thread:$0]  (!%p3220_p7), %s3726_s4, 16, %s262_s11, [#allocation10]  }
  0x31   : > { %p3728_p1 = scmp.ne.s32.totalorder %s3725_s15, 0  ;;  %p76_p4 = scmp.ne.s32.totalorder %s3101_s26, %s3097_s25 }
  0x32   : > { %p77_p5 = scmp.eq.s32.totalorder %s3113_s29, 0  ;;  %p2716_p8 = scmp.lt.s32.totalorder %s3113_s29, 4 }
  0x33   : > { %s3758_s13 = smov (%p3728_p1, %s33_s13), 0  ;;  %s296_s19 = sand.u32 1, %s3113_s29  }
  0x34   : > { %3729 = sst [smem:[#allocation21_spill]] %s3758_s13  ;;  %s66_s18 = ssub.s32 %s3109_s28, %s3758_s13 }
  0x35   : > { %p67_p9 = scmp.eq.s32.totalorder %s66_s18, 0  ;;  %p78_p11 = por %p77_p5, %p76_p4 }
  0x36   : > { %s3708_s20 = sand.u32 1, %s3101_s26   ;;  %s2565_s24 = sshll.u32 %s3109_s28, 9 }
  0x37   : > { %s3269_s22 = scalar_select %p67_p9, %s3101_s26, %s69_s14  }
  0x38   : > { %s2349_s23 = sshll.u32 %s3708_s20, 10  ;;  %s3731_s1 = sld [smem:[#allocation24_spill]] }
  0x39   : > { %3730 = sst [smem:[#allocation22_spill]] %s3269_s22  ;;  %s300_s16 = scalar_lea.vmem [#allocation6], %s2349_s23 }
  0x3a   : > { %s307_s17 = sshll.u32 %s300_s16, 4  ;;  %p3281_p12 = pnand %p2716_p8, %p78_p11  ;;  %s3279_s17 = int_to_ptr.vmem [resolvable:$true] %s307_s17 }
  0x3b   : > { %s3285_s14 = scalar_lea.sflag [#allocation7], %s296_s19 }
  0x3c   : > { %s3732_s18 = scalar_select %p3281_p12, 1, 0 }
  0x3d   : > { %p3713_p0 = pneg %p3281_p12 }
  0x3e   : > { %s3277_s15 = scalar_lea.hbm %s3731_s1, %s2565_s24  ;;  %s2882_s10 = scalar_lea.hbm %s3731_s1, 65536 }
  0x3f   : > { %s2877_s20 = scalar_lea.hbm %s3277_s15, 16384  ;;  %p2883_p6 = scmp.lt.u32.totalorder %s3277_s15, %s3731_s1 }
  0x40   : > { %p2878_p13 = scmp.ne.s32.totalorder %s3277_s15, %s2877_s20  ;;  %p2884_p1 = scmp.lt.u32.totalorder %s2882_s10, %s2877_s20 }
  0x41   : > { %p2886_p5 = scmp.lt.u32.totalorder %s2877_s20, %s3277_s15 }
  0x42   : > { %p2880_p2 = pnand %p3713_p0, %p2878_p13  ;;  %p2885_p4 = por %p2884_p1, %p2883_p6 }
  0x44   : > { %p2881_p3 = pneg %p2880_p2  ;;  %p2887_p8 = por %p2886_p5, %p2885_p4 }
  0x46   : > { %p2888_p9 = pnand %p2887_p8, %p2881_p3 }
  0x48   : > { %2891 = shalt.err (!%p2888_p9)
}
  0x49   : > { %s2892_s19 = scalar_lea.vmem %s3279_s17, 16384  ;;  %s3116_s23 = smov [#allocation6]  }
  0x4a   : > { %p2893_p11 = scmp.ne.s32.totalorder %s3279_s17, %s2892_s19  ;;  %s2897_s24 = sshll.u32 %s3116_s23, 4  ;;  %s2898_s24 = int_to_ptr.vmem [resolvable:$false] %s2897_s24 }
  0x4b   : > { %s2899_s11 = scalar_lea.vmem %s2898_s24, 32768  ;;  %p2900_p7 = scmp.lt.s32.totalorder %s3279_s17, %s2898_s24 }
  0x4c   : > { %p2895_p13 = pnand %p2893_p11, %p3713_p0  ;;  %p2901_p6 = scmp.lt.s32.totalorder %s2899_s11, %s2892_s19 }
  0x4e   : > { %p2896_p2 = pneg %p2895_p13  ;;  %p2902_p1 = por %p2901_p6, %p2900_p7 }
  0x50   : > { %p2903_p4 = pnand %p2902_p1, %p2896_p2 }
  0x52   : > { %2906 = shalt.err (!%p2903_p4)
}
  0x53   : > { %s3117_s20 = smov 2048   ;;  %s3118_s10 = smov 512  }
  0x54   : > { %s3119_s16 = smov 32   ;;  %s3120_s1 = smov [#allocation3]  }
  0x55   : > { %2708 = dma.hbm_to_vmem [thread:$0]  (!%p3281_p12), %s3277_s15, 16384, %s3279_s17, %s3285_s14, %s3117_s20, %s3118_s10, %s3119_s16  }
  0x56   : > { %s250_s4 = sshll.u32 %s3120_s1, 4  ;;  %s3733_s0 = sld [smem:[#allocation23_spill]]  ;;  %s251_s4 = int_to_ptr.vmem [resolvable:$true] %s250_s4 }
  0x5c   : > { %s2907_s19 = scalar_lea.hbm %s3733_s0, 256 }
  0x5d   : > { %p2908_p7 = scmp.ne.s32.totalorder %s3733_s0, %s2907_s19  ;;  %p2914_p8 = scmp.lt.u32.totalorder %s2907_s19, %s3733_s0 }
  0x5f   : > { %p2910_p3 = pnand %p2908_p7, %p3238_p10 }
  0x61   : > { %p2911_p5 = pneg %p2910_p3 }
  0x63   : > { %p2916_p9 = pnand %p2914_p8, %p2911_p5 }
  0x65   : > { %2919 = shalt.err (!%p2916_p9)
}
  0x66   : > { %s2920_s15 = scalar_lea.vmem %s251_s4, 256  ;;  %p2928_p6 = scmp.lt.s32.totalorder %s251_s4, %s251_s4 }
  0x67   : > { %p2921_p11 = scmp.ne.s32.totalorder %s251_s4, %s2920_s15  ;;  %p2929_p1 = scmp.lt.s32.totalorder %s2920_s15, %s2920_s15 }
  0x69   : > { %p2923_p13 = pnand %p2921_p11, %p3238_p10  ;;  %p2930_p4 = por %p2929_p1, %p2928_p6 }
  0x6b   : > { %p2924_p2 = pneg %p2923_p13 }
  0x6d   : > { %p2931_p0 = pnand %p2930_p4, %p2924_p2 }
  0x6f   : > { %2934 = shalt.err (!%p2931_p0)
}
  0x70   : > { %p3734_p7 = scmp.ne.s32.totalorder %s3724_s12, 0  ;;  %s3121_s29 = smov [#allocation11]  }
  0x71   : > { %s271_s22 = sshll.u32 %s3121_s29, 4  ;;  %s2935_s10 = scalar_lea.hbm %s3702_s5, 256  ;;  %s272_s22 = int_to_ptr.vmem [resolvable:$true] %s271_s22 }
  0x72   : > { %2695 = dma.hbm_to_vmem [thread:$0]  (!%p3734_p7), %s3733_s0, 256, %s251_s4, [#allocation4]  }
  0x73   : > { %p2936_p3 = scmp.ne.s32.totalorder %s3702_s5, %s2935_s10  ;;  %p2942_p8 = scmp.lt.u32.totalorder %s2935_s10, %s3702_s5 }
  0x75   : > { %p2938_p0 = pnand %p2936_p3, %p3238_p10 }
  0x77   : > { %p2939_p5 = pneg %p2938_p0 }
  0x79   : > { %p2944_p9 = pnand %p2942_p8, %p2939_p5 }
  0x7b   : > { %2947 = shalt.err (!%p2944_p9)
}
  0x7c   : > { %s2948_s4 = scalar_lea.vmem %s272_s22, 256  ;;  %p2956_p6 = scmp.lt.s32.totalorder %s272_s22, %s272_s22 }
  0x7d   : > { %p2949_p11 = scmp.ne.s32.totalorder %s272_s22, %s2948_s4  ;;  %p2957_p1 = scmp.lt.s32.totalorder %s2948_s4, %s2948_s4 }
  0x7f   : > { %p2951_p13 = pnand %p2949_p11, %p3238_p10  ;;  %p2958_p4 = por %p2957_p1, %p2956_p6 }
  0x81   : > { %p2952_p2 = pneg %p2951_p13 }
  0x83   : > { %p2959_p12 = pnand %p2958_p4, %p2952_p2 }
  0x85   : > { %2962 = shalt.err (!%p2959_p12)
}
  0x86   : > { %s3122_s11 = smov 128   ;;  %s3123_s15 = smov 8  }
  0x87   : > { %2701 = dma.hbm_to_vmem [thread:$0]  (!%p3734_p7), %s3702_s5, 256, %s272_s22, [#allocation10], %s3122_s11, %s3122_s11, %s3123_s15  }
  0x88   : > { %s3735_s29 = sand.u32 1, %s3101_s26   ;;  %s3124_s20 = smov [#allocation12]  }
  0x89   : > { %s2352_s17 = sshll.u32 %s3735_s29, 3  ;;  %s285_s10 = sshll.u32 %s3124_s20, 4  ;;  %s286_s10 = int_to_ptr.vmem [resolvable:$true] %s285_s10 }
  0x8a   : > { %s2566_s16 = sshll.u32 %s3109_s28, 7  ;;  %s2963_s24 = scalar_lea.hbm %s3703_s6, 16 }
  0x8b   : > { %p2964_p12 = scmp.ne.s32.totalorder %s3703_s6, %s2963_s24  ;;  %p2970_p5 = scmp.lt.u32.totalorder %s2963_s24, %s3703_s6 }
  0x8d   : > { %p2966_p3 = pnand %p2964_p12, %p3238_p10 }
  0x8f   : > { %p2967_p0 = pneg %p2966_p3 }
  0x91   : > { %p2972_p8 = pnand %p2970_p5, %p2967_p0 }
  0x93   : > { %2975 = shalt.err (!%p2972_p8)
}
  0x94   : > { %s2976_s22 = scalar_lea.vmem %s286_s10, 16  ;;  %s2983_s11 = scalar_lea.vmem %s286_s10, 32 }
  0x95   : > { %p2977_p9 = scmp.ne.s32.totalorder %s286_s10, %s2976_s22  ;;  %p2984_p2 = scmp.lt.s32.totalorder %s286_s10, %s286_s10 }
  0x96   : > { %p2985_p6 = scmp.lt.s32.totalorder %s2983_s11, %s2976_s22 }
  0x97   : > { %p2979_p11 = pnand %p2977_p9, %p3238_p10 }
  0x98   : > { %p2986_p1 = por %p2985_p6, %p2984_p2 }
  0x99   : > { %p2980_p13 = pneg %p2979_p11 }
  0x9b   : > { %p2987_p4 = pnand %p2986_p1, %p2980_p13 }
  0x9d   : > { %2990 = shalt.err (!%p2987_p4)
}
  0x9e   : > { %2704 = dma.hbm_to_vmem [thread:$0]  (!%p3734_p7), %s3703_s6, 16, %s286_s10, [#allocation13]  }
  0x9f   : > { %s3373_s29 = scalar_lea.hbm %s3699_s2, %s2566_s16  ;;  %s321_s21 = scalar_lea.vmem [#allocation8], %s2352_s17 }
  0xa0   : > { %s329_s20 = sshll.u32 %s321_s21, 4  ;;  %s2991_s23 = scalar_lea.hbm %s3373_s29, 128  ;;  %s330_s20 = int_to_ptr.vmem [resolvable:$true] %s329_s20 }
  0xa1   : > { %p2992_p10 = scmp.ne.s32.totalorder %s3373_s29, %s2991_s23  ;;  %p3736_p12 = scmp.ne.s32.totalorder %s3732_s18, 0 }
  0xa2   : > { %s2996_s19 = scalar_lea.hbm %s3699_s2, 512  ;;  %p2997_p7 = scmp.lt.u32.totalorder %s3373_s29, %s3699_s2 }
  0xa3   : > { %p3737_p3 = pneg %p3736_p12  ;;  %p2998_p8 = scmp.lt.u32.totalorder %s2996_s19, %s2991_s23 }
  0xa4   : > { %p3000_p11 = scmp.lt.u32.totalorder %s2991_s23, %s3373_s29 }
  0xa5   : > { %p2994_p0 = pnand %p2992_p10, %p3737_p3  ;;  %p2999_p9 = por %p2998_p8, %p2997_p7 }
  0xa7   : > { %p2995_p5 = pneg %p2994_p0  ;;  %p3001_p13 = por %p3000_p11, %p2999_p9 }
  0xa9   : > { %p3002_p2 = pnand %p3001_p13, %p2995_p5 }
  0xab   : > { %3005 = shalt.err (!%p3002_p2)
}
  0xac   : > { %s3006_s17 = scalar_lea.vmem %s330_s20, 128  ;;  %p3738_p1 = pmov %p3737_p3 }
  0xad   : > { %p3007_p6 = scmp.ne.s32.totalorder %s330_s20, %s3006_s17  ;;  %s3125_s4 = smov [#allocation8]  }
  0xae   : > { %s3011_s1 = sshll.u32 %s3125_s4, 4  ;;  %s3012_s1 = int_to_ptr.vmem [resolvable:$false] %s3011_s1 }
  0xaf   : > { %p3009_p4 = pnand %p3007_p6, %p3738_p1  ;;  %s3013_s22 = scalar_lea.vmem %s3012_s1, 256 }
  0xb0   : > { %p3014_p3 = scmp.lt.s32.totalorder %s330_s20, %s3012_s1  ;;  %p3015_p0 = scmp.lt.s32.totalorder %s3013_s22, %s3006_s17 }
  0xb1   : > { %p3010_p10 = pneg %p3009_p4 }
  0xb2   : > { %p3016_p7 = por %p3015_p0, %p3014_p3 }
  0xb4   : > { %p3017_p8 = pnand %p3016_p7, %p3010_p10 }
  0xb6   : > { %3020 = shalt.err (!%p3017_p8)
}
  0xb7   : > { %2711 = dma.hbm_to_vmem [thread:$0]  (!%p3736_p12), %s3373_s29, 128, %s330_s20, %s3285_s14  }
  0xb8   : > { %p3739_p5 = scmp.ne.s32.totalorder %s3723_s9, 0 }
  0xb9   : > { %p3740_p9 = scmp.eq.s32.totalorder (!%p3739_p5), %s3200_s30, 0 }
  0xba   : > { %347 = sbr.rel (%p3739_p5) target bundleno = 1046 (0x416), region = 48 }
  0xc1   : > { %3072 = dma.done.wait (%p3740_p9), [#allocation4], 256   ;;  %p3741_p11 = pmov %p3740_p9 }
  0xc2   : > { %s353_s11 = sand.u32 1, %s3200_s30   ;;  %s355_s0 = sand.u32 1, %s3097_s25  }
  0xc3   : > { %3074 = vsyncadd (%p3741_p11), [#allocation4], 4294967040  ;;  %s2357_s15 = sshll.u32 %s355_s0, 10  ;;  %s354_s7 = scalar_lea.sflag [#allocation7], %s353_s11 }
  0xc4   : > { %s3403_s18 = scalar_lea.vmem [#allocation6], %s2357_s15  ;;  %p3742_p13 = scmp.ne.s32.totalorder %s3722_s8, 0 }
  0xc6   : > { %3076 = dma.done.wait (%p3742_p13), %s354_s7, 16512  }
  0xc7   : > { %3078 = vsyncadd (%p3742_p13), %s354_s7, 4294950784  ;;  %s3409_s9 = sshll.u32 %s355_s0, 3  ;;  %p3743_p12 = pmov %p3740_p9 }
  0xc8   : > { %s366_s14 = scalar_lea.vmem [#allocation8], %s3409_s9 }
  0xc9   : > { %3080 = dma.done.wait (%p3743_p12), [#allocation10], 272   ;;  %p3744_p2 = pmov %p3740_p9 }
  0xcb   : > { %3082 = vsyncadd (%p3744_p2), [#allocation10], 4294967024  ;;  %p3745_p6 = pmov %p3744_p2 }
  0xcc   : > { %p3746_p1 = pmov %p3744_p2 }
  0xcd   : > { %3084 = dma.done.wait (%p3745_p6), [#allocation13], 16  }
  0xce   : > { %3086 = vsyncadd (%p3746_p1), [#allocation13], 4294967280  ;;  %s2362_s13 = sshll.u32 %s3105_s27, 7  ;;  %p2364_p10 = scmp.ne.s32.totalorder %s3105_s27, 0 }
  0xcf   : > { %p417_p4 = scmp.lt.s32.totalorder %s2362_s13, 511  ;;  %vm427_vm0 = vcmask (!%p2364_p10), 130048   ;;  %v3126_v0 = vmov (!%p2364_p10), 0.0  }
  0xd0   : > { %426 = sbr.rel (%p2364_p10) target bundleno = 215 (0xd7), region = 76  ;;  %428 = vst.msk [vmem:[#allocation2] sm:$0xff] (!%p2364_p10), %vm427_vm0, %v3126_v0 }
  0xd1   : > { %s3760_s13 = smov (!%p417_p4, %s2362_s13), 511 }
  0xd2   : > { %s2363_s8 = sshll.u32 %s3760_s13, 2 }
  0xd3   : > { %s3424_s20 = scalar_lea.vmem %s3700_s3, %s2363_s8 }
  0xd7 PF: > { %v433_v1 = vld [vmem:[%s3403_s18] sm:$0xff]  ;;  %v434_v3 = vld [vmem:[%s3403_s18 + $0x8] sm:$0xff]  ;;  %v430_v54 = vld [vmem:[#allocation3 + $0x8] sm:$0xff]  ;;  %vm2097_vm1 = vcmask 130048   ;;  %p2557_p3 = scmp.ne.s32.totalorder %s3105_s27, 3 }
  0xd8   : > { %v437_v2 = vld [vmem:[%s3403_s18 + $0x20] sm:$0xff]  ;;  %v438_v5 = vld [vmem:[%s3403_s18 + $0x28] sm:$0xff]  ;;  %v3457_v58 = vpack.c.bf16 %v430_v54, %v430_v54  ;;  %vm3128_vm2 = vmmov (!%p2557_p3), 0   ;;  %vm2195_vm3 = vcmask (!%p2557_p3), 80896  }
  0xd9   : > { %v2366_v4 = vcombine.high %v433_v1, %v437_v2  ;;  %v2365_v6 = vcombine.low %v433_v1, %v437_v2  ;;  %v441_v7 = vld [vmem:[%s3403_s18 + $0x40] sm:$0xff]  ;;  %v2368_v9 = vcombine.high %v434_v3, %v438_v5  ;;  %v2367_v10 = vcombine.low %v434_v3, %v438_v5  ;;  %v442_v12 = vld [vmem:[%s3403_s18 + $0x48] sm:$0xff] }
  0xda   : > { %v445_v8 = vld [vmem:[%s3403_s18 + $0x60] sm:$0xff]  ;;  %v446_v13 = vld [vmem:[%s3403_s18 + $0x68] sm:$0xff]  ;;  %1275 = vmatprep.mubr.bf16.mxu0 %v3457_v58  ;;  %1316 = vmatprep.mubr.bf16.mxu1 %v3457_v58 }
  0xdb   : > { %v2374_v11 = vcombine.high %v441_v7, %v445_v8  ;;  %v449_v14 = vld [vmem:[%s3403_s18 + $0x80] sm:$0xff]  ;;  %1243 = vmatprep.subr.bf16.mxu0 %v2366_v4  ;;  %v2376_v15 = vcombine.high %v442_v12, %v446_v13  ;;  %v450_v17 = vld [vmem:[%s3403_s18 + $0x88] sm:$0xff]  ;;  %1284 = vmatprep.subr.bf16.mxu1 %v2368_v9  ;;  %v2373_v19 = vcombine.low %v441_v7, %v445_v8 }
  0xdc   : > { %v453_v16 = vld [vmem:[%s3403_s18 + $0xa0] sm:$0xff]  ;;  %v454_v18 = vld [vmem:[%s3403_s18 + $0xa8] sm:$0xff]  ;;  %1244 = vmatpush1.bf16.msra.mxu0 %v2365_v6  ;;  %1285 = vmatpush1.bf16.msra.mxu1 %v2367_v10  ;;  %v2375_v20 = vcombine.low %v442_v12, %v446_v13 }
  0xdd   : > { %1245 = vmatprep.subr.bf16.mxu0 %v2374_v11  ;;  %v2382_v21 = vcombine.high %v449_v14, %v453_v16  ;;  %1286 = vmatprep.subr.bf16.mxu1 %v2376_v15  ;;  %v2384_v22 = vcombine.high %v450_v17, %v454_v18  ;;  %v457_v23 = vld [vmem:[%s3403_s18 + $0xc0] sm:$0xff]  ;;  %v458_v25 = vld [vmem:[%s3403_s18 + $0xc8] sm:$0xff]  ;;  %v2381_v27 = vcombine.low %v449_v14, %v453_v16 }
  0xde   : > { %v461_v24 = vld [vmem:[%s3403_s18 + $0xe0] sm:$0xff]  ;;  %v462_v26 = vld [vmem:[%s3403_s18 + $0xe8] sm:$0xff]  ;;  %v2383_v28 = vcombine.low %v450_v17, %v454_v18 }
  0xdf   : > { %v2390_v29 = vcombine.high %v457_v23, %v461_v24  ;;  %v2392_v30 = vcombine.high %v458_v25, %v462_v26  ;;  %v465_v31 = vld [vmem:[%s3403_s18 + $0x100] sm:$0xff]  ;;  %v466_v33 = vld [vmem:[%s3403_s18 + $0x108] sm:$0xff]  ;;  %v2389_v35 = vcombine.low %v457_v23, %v461_v24  ;;  %v2391_v36 = vcombine.low %v458_v25, %v462_v26 }
  0xe0   : > { %1246 = vmatpush1.bf16.msra.mxu0 %v2373_v19  ;;  %1287 = vmatpush1.bf16.msra.mxu1 %v2375_v20  ;;  %v469_v32 = vld [vmem:[%s3403_s18 + $0x120] sm:$0xff]  ;;  %v470_v34 = vld [vmem:[%s3403_s18 + $0x128] sm:$0xff] }
  0xe1   : > { %1247 = vmatprep.subr.bf16.mxu0 %v2382_v21  ;;  %1288 = vmatprep.subr.bf16.mxu1 %v2384_v22  ;;  %v2398_v37 = vcombine.high %v465_v31, %v469_v32  ;;  %v2400_v38 = vcombine.high %v466_v33, %v470_v34  ;;  %v473_v39 = vld [vmem:[%s3403_s18 + $0x140] sm:$0xff]  ;;  %v474_v41 = vld [vmem:[%s3403_s18 + $0x148] sm:$0xff]  ;;  %v2397_v43 = vcombine.low %v465_v31, %v469_v32 }
  0xe2   : > { %v477_v40 = vld [vmem:[%s3403_s18 + $0x160] sm:$0xff]  ;;  %v478_v42 = vld [vmem:[%s3403_s18 + $0x168] sm:$0xff]  ;;  %v2399_v44 = vcombine.low %v466_v33, %v470_v34 }
  0xe3   : > { %v2406_v45 = vcombine.high %v473_v39, %v477_v40  ;;  %v2408_v46 = vcombine.high %v474_v41, %v478_v42  ;;  %v481_v47 = vld [vmem:[%s3403_s18 + $0x180] sm:$0xff]  ;;  %v482_v49 = vld [vmem:[%s3403_s18 + $0x188] sm:$0xff]  ;;  %v2405_v51 = vcombine.low %v473_v39, %v477_v40  ;;  %v2407_v52 = vcombine.low %v474_v41, %v478_v42 }
  0xe4   : > { %1248 = vmatpush1.bf16.msra.mxu0 %v2381_v27  ;;  %1289 = vmatpush1.bf16.msra.mxu1 %v2383_v28  ;;  %v485_v48 = vld [vmem:[%s3403_s18 + $0x1a0] sm:$0xff]  ;;  %v486_v50 = vld [vmem:[%s3403_s18 + $0x1a8] sm:$0xff] }
  0xe5   : > { %1249 = vmatprep.subr.bf16.mxu0 %v2390_v29  ;;  %1290 = vmatprep.subr.bf16.mxu1 %v2392_v30  ;;  %v2414_v53 = vcombine.high %v481_v47, %v485_v48  ;;  %v2416_v55 = vcombine.high %v482_v49, %v486_v50  ;;  %v489_v56 = vld [vmem:[%s3403_s18 + $0x1c0] sm:$0xff]  ;;  %v490_v59 = vld [vmem:[%s3403_s18 + $0x1c8] sm:$0xff]  ;;  %v2413_v61 = vcombine.low %v481_v47, %v485_v48 }
  0xe6   : > { %v493_v57 = vld [vmem:[%s3403_s18 + $0x1e0] sm:$0xff]  ;;  %v494_v60 = vld [vmem:[%s3403_s18 + $0x1e8] sm:$0xff]  ;;  %v2415_v62 = vcombine.low %v482_v49, %v486_v50 }
  0xe7   : > { %v2422_v63 = vcombine.high %v489_v56, %v493_v57  ;;  %v2424_v0 = vcombine.high %v490_v59, %v494_v60  ;;  %v497_v1 = vld [vmem:[%s3403_s18 + $0x200] sm:$0xff]  ;;  %v498_v3 = vld [vmem:[%s3403_s18 + $0x208] sm:$0xff]  ;;  %v2421_v5 = vcombine.low %v489_v56, %v493_v57  ;;  %v2423_v6 = vcombine.low %v490_v59, %v494_v60 }
  0xe8   : > { %1250 = vmatpush1.bf16.msra.mxu0 %v2389_v35  ;;  %1291 = vmatpush1.bf16.msra.mxu1 %v2391_v36  ;;  %v501_v2 = vld [vmem:[%s3403_s18 + $0x220] sm:$0xff]  ;;  %v502_v4 = vld [vmem:[%s3403_s18 + $0x228] sm:$0xff] }
  0xe9   : > { %1251 = vmatprep.subr.bf16.mxu0 %v2398_v37  ;;  %1292 = vmatprep.subr.bf16.mxu1 %v2400_v38  ;;  %v2430_v7 = vcombine.high %v497_v1, %v501_v2  ;;  %v2432_v8 = vcombine.high %v498_v3, %v502_v4  ;;  %v505_v9 = vld [vmem:[%s3403_s18 + $0x240] sm:$0xff]  ;;  %v506_v11 = vld [vmem:[%s3403_s18 + $0x248] sm:$0xff]  ;;  %v2429_v13 = vcombine.low %v497_v1, %v501_v2  ;;  %v439_v2 = vld [vmem:[%s3403_s18 + $0x30] sm:$0xff] }
  0xea   : > { %v509_v10 = vld [vmem:[%s3403_s18 + $0x260] sm:$0xff]  ;;  %v510_v12 = vld [vmem:[%s3403_s18 + $0x268] sm:$0xff]  ;;  %v2431_v14 = vcombine.low %v498_v3, %v502_v4  ;;  %v429_v4 = vld [vmem:[#allocation3] sm:$0xff] }
  0xeb   : > { %v2438_v15 = vcombine.high %v505_v9, %v509_v10  ;;  %v2440_v16 = vcombine.high %v506_v11, %v510_v12  ;;  %v513_v17 = vld [vmem:[%s3403_s18 + $0x280] sm:$0xff]  ;;  %v514_v19 = vld [vmem:[%s3403_s18 + $0x288] sm:$0xff]  ;;  %v2437_v21 = vcombine.low %v505_v9, %v509_v10  ;;  %v2439_v22 = vcombine.low %v506_v11, %v510_v12  ;;  %v447_v11 = vld [vmem:[%s3403_s18 + $0x70] sm:$0xff] }
  0xec   : > { %1252 = vmatpush1.bf16.msra.mxu0 %v2397_v43  ;;  %1293 = vmatpush1.bf16.msra.mxu1 %v2399_v44  ;;  %v517_v18 = vld [vmem:[%s3403_s18 + $0x2a0] sm:$0xff]  ;;  %v518_v20 = vld [vmem:[%s3403_s18 + $0x2a8] sm:$0xff] }
  0xed   : > { %1253 = vmatprep.subr.bf16.mxu0 %v2406_v45  ;;  %1294 = vmatprep.subr.bf16.mxu1 %v2408_v46  ;;  %v2446_v23 = vcombine.high %v513_v17, %v517_v18  ;;  %v2448_v24 = vcombine.high %v514_v19, %v518_v20  ;;  %v521_v25 = vld [vmem:[%s3403_s18 + $0x2c0] sm:$0xff]  ;;  %v522_v27 = vld [vmem:[%s3403_s18 + $0x2c8] sm:$0xff]  ;;  %v2445_v29 = vcombine.low %v513_v17, %v517_v18 }
  0xee   : > { %v525_v26 = vld [vmem:[%s3403_s18 + $0x2e0] sm:$0xff]  ;;  %v526_v28 = vld [vmem:[%s3403_s18 + $0x2e8] sm:$0xff]  ;;  %v2447_v30 = vcombine.low %v514_v19, %v518_v20  ;;  %v451_v19 = vld [vmem:[%s3403_s18 + $0x90] sm:$0xff] }
  0xef   : > { %v2454_v31 = vcombine.high %v521_v25, %v525_v26  ;;  %v2456_v32 = vcombine.high %v522_v27, %v526_v28  ;;  %v529_v33 = vld [vmem:[%s3403_s18 + $0x300] sm:$0xff]  ;;  %v530_v35 = vld [vmem:[%s3403_s18 + $0x308] sm:$0xff]  ;;  %v2453_v37 = vcombine.low %v521_v25, %v525_v26  ;;  %v2455_v39 = vcombine.low %v522_v27, %v526_v28  ;;  %v459_v25 = vld [vmem:[%s3403_s18 + $0xd0] sm:$0xff] }
  0xf0   : > { %1254 = vmatpush1.bf16.msra.mxu0 %v2405_v51  ;;  %1295 = vmatpush1.bf16.msra.mxu1 %v2407_v52  ;;  %v533_v34 = vld [vmem:[%s3403_s18 + $0x320] sm:$0xff]  ;;  %v534_v36 = vld [vmem:[%s3403_s18 + $0x328] sm:$0xff]  ;;  %v463_v26 = vld [vmem:[%s3403_s18 + $0xf0] sm:$0xff] }
  0xf1   : > { %1255 = vmatprep.subr.bf16.mxu0 %v2414_v53  ;;  %1296 = vmatprep.subr.bf16.mxu1 %v2416_v55  ;;  %v537_v38 = vld [vmem:[%s3403_s18 + $0x340] sm:$0xff]  ;;  %v2462_v40 = vcombine.high %v529_v33, %v533_v34  ;;  %v2464_v42 = vcombine.high %v530_v35, %v534_v36  ;;  %v538_v43 = vld [vmem:[%s3403_s18 + $0x348] sm:$0xff]  ;;  %v2461_v45 = vcombine.low %v529_v33, %v533_v34  ;;  %v467_v33 = vld [vmem:[%s3403_s18 + $0x110] sm:$0xff] }
  0xf2   : > { %v541_v41 = vld [vmem:[%s3403_s18 + $0x360] sm:$0xff]  ;;  %v542_v44 = vld [vmem:[%s3403_s18 + $0x368] sm:$0xff]  ;;  %v2463_v47 = vcombine.low %v530_v35, %v534_v36  ;;  %v471_v34 = vld [vmem:[%s3403_s18 + $0x130] sm:$0xff]  ;;  %v2394_v36 = vcombine.high %v459_v25, %v463_v26 }
  0xf3   : > { %v545_v46 = vld [vmem:[%s3403_s18 + $0x380] sm:$0xff]  ;;  %v2470_v48 = vcombine.high %v537_v38, %v541_v41  ;;  %v2472_v50 = vcombine.high %v538_v43, %v542_v44  ;;  %v546_v51 = vld [vmem:[%s3403_s18 + $0x388] sm:$0xff]  ;;  %v2469_v53 = vcombine.low %v537_v38, %v541_v41  ;;  %v2471_v55 = vcombine.low %v538_v43, %v542_v44  ;;  %v472_v38 = vld [vmem:[%s3403_s18 + $0x138] sm:$0xff] }
  0xf4   : > { %1256 = vmatpush1.bf16.msra.mxu0 %v2413_v61  ;;  %1297 = vmatpush1.bf16.msra.mxu1 %v2415_v62  ;;  %v549_v49 = vld [vmem:[%s3403_s18 + $0x3a0] sm:$0xff]  ;;  %v550_v52 = vld [vmem:[%s3403_s18 + $0x3a8] sm:$0xff]  ;;  %v479_v41 = vld [vmem:[%s3403_s18 + $0x170] sm:$0xff]  ;;  %v2402_v43 = vcombine.high %v467_v33, %v471_v34 }
  0xf5   : > { %1257 = vmatprep.subr.bf16.mxu0 %v2422_v63  ;;  %1298 = vmatprep.subr.bf16.mxu1 %v2424_v0  ;;  %v553_v54 = vld [vmem:[%s3403_s18 + $0x3c0] sm:$0xff]  ;;  %v2478_v56 = vcombine.high %v545_v46, %v549_v49  ;;  %v2480_v59 = vcombine.high %v546_v51, %v550_v52  ;;  %v554_v60 = vld [vmem:[%s3403_s18 + $0x3c8] sm:$0xff]  ;;  %v2477_v62 = vcombine.low %v545_v46, %v549_v49  ;;  %v435_v63 = vld [vmem:[%s3403_s18 + $0x10] sm:$0xff] }
  0xf6   : > { %v557_v57 = vld [vmem:[%s3403_s18 + $0x3e0] sm:$0xff]  ;;  %v558_v61 = vld [vmem:[%s3403_s18 + $0x3e8] sm:$0xff]  ;;  %v2479_v0 = vcombine.low %v546_v51, %v550_v52  ;;  %v2370_v10 = vcombine.high %v435_v63, %v439_v2  ;;  %v476_v44 = vld [vmem:[%s3403_s18 + $0x158] sm:$0xff] }
  0xf7   : > { %v2486_v1 = vcombine.high %v553_v54, %v557_v57  ;;  %v2488_v3 = vcombine.high %v554_v60, %v558_v61  ;;  %v2487_v9 = vcombine.low %v554_v60, %v558_v61  ;;  %v487_v49 = vld [vmem:[%s3403_s18 + $0x1b0] sm:$0xff]  ;;  %v484_v52 = vld [vmem:[%s3403_s18 + $0x198] sm:$0xff] }
  0xf8   : > { %1258 = vmatpush1.bf16.msra.mxu0 %v2421_v5  ;;  %1299 = vmatpush1.bf16.msra.mxu1 %v2423_v6  ;;  %v436_v5 = vld [vmem:[%s3403_s18 + $0x18] sm:$0xff] }
  0xf9   : > { %1259 = vmatprep.subr.bf16.mxu0 %v2430_v7  ;;  %1300 = vmatprep.subr.bf16.mxu1 %v2432_v8  ;;  %v440_v6 = vld [vmem:[%s3403_s18 + $0x38] sm:$0xff]  ;;  %v2485_v7 = vcombine.low %v553_v54, %v557_v57  ;;  %v443_v8 = vld [vmem:[%s3403_s18 + $0x50] sm:$0xff] }
  0xfa   : > { %v2372_v12 = vcombine.high %v436_v5, %v440_v6  ;;  %v2371_v17 = vcombine.low %v436_v5, %v440_v6  ;;  %v2378_v18 = vcombine.high %v443_v8, %v447_v11  ;;  %v495_v57 = vld [vmem:[%s3403_s18 + $0x1f0] sm:$0xff]  ;;  %v492_v61 = vld [vmem:[%s3403_s18 + $0x1d8] sm:$0xff] }
  0xfb   : > { %v500_v5 = vld [vmem:[%s3403_s18 + $0x218] sm:$0xff] }
  0xfc   : > { %1260 = vmatpush1.bf16.msra.mxu0 %v2429_v13  ;;  %1301 = vmatpush1.bf16.msra.mxu1 %v2431_v14  ;;  %v444_v13 = vld [vmem:[%s3403_s18 + $0x58] sm:$0xff]  ;;  %v3502_v14 = vpack.c.bf16 %v429_v4, %v429_v4 }
  0xfd   : > { %1261 = vmatprep.subr.bf16.mxu0 %v2438_v15  ;;  %1302 = vmatprep.subr.bf16.mxu1 %v2440_v16  ;;  %v448_v15 = vld [vmem:[%s3403_s18 + $0x78] sm:$0xff]  ;;  %v2369_v16 = vcombine.low %v435_v63, %v439_v2  ;;  %v503_v2 = vld [vmem:[%s3403_s18 + $0x230] sm:$0xff] }
  0xfe   : > { %v2380_v20 = vcombine.high %v444_v13, %v448_v15  ;;  %v2379_v27 = vcombine.low %v444_v13, %v448_v15  ;;  %v504_v6 = vld [vmem:[%s3403_s18 + $0x238] sm:$0xff]  ;;  %v511_v13 = vld [vmem:[%s3403_s18 + $0x270] sm:$0xff] }
  0xff   : > { %v508_v15 = vld [vmem:[%s3403_s18 + $0x258] sm:$0xff] }
 0x100   : > { %1262 = vmatpush1.bf16.msra.mxu0 %v2437_v21  ;;  %1303 = vmatpush1.bf16.msra.mxu1 %v2439_v22  ;;  %v455_v21 = vld [vmem:[%s3403_s18 + $0xb0] sm:$0xff]  ;;  %v452_v22 = vld [vmem:[%s3403_s18 + $0x98] sm:$0xff] }
 0x101   : > { %1263 = vmatprep.subr.bf16.mxu0 %v2446_v23  ;;  %1304 = vmatprep.subr.bf16.mxu1 %v2448_v24  ;;  %v456_v23 = vld [vmem:[%s3403_s18 + $0xb8] sm:$0xff]  ;;  %v2377_v24 = vcombine.low %v443_v8, %v447_v11  ;;  %v2386_v28 = vcombine.high %v451_v19, %v455_v21  ;;  %v2436_v11 = vcombine.high %v500_v5, %v504_v6 }
 0x102   : > { %v2387_v35 = vcombine.low %v452_v22, %v456_v23 }
 0x104   : > { %1264 = vmatpush1.bf16.msra.mxu0 %v2445_v29  ;;  %1305 = vmatpush1.bf16.msra.mxu1 %v2447_v30  ;;  %v460_v29 = vld [vmem:[%s3403_s18 + $0xd8] sm:$0xff] }
 0x105   : > { %1265 = vmatprep.subr.bf16.mxu0 %v2454_v31  ;;  %1306 = vmatprep.subr.bf16.mxu1 %v2456_v32  ;;  %v464_v30 = vld [vmem:[%s3403_s18 + $0xf8] sm:$0xff]  ;;  %v2388_v31 = vcombine.high %v452_v22, %v456_v23  ;;  %v2385_v32 = vcombine.low %v451_v19, %v455_v21  ;;  %v515_v21 = vld [vmem:[%s3403_s18 + $0x290] sm:$0xff] }
 0x106   : > { %v519_v22 = vld [vmem:[%s3403_s18 + $0x2b0] sm:$0xff]  ;;  %v516_v23 = vld [vmem:[%s3403_s18 + $0x298] sm:$0xff] }
 0x108   : > { %1266 = vmatpush1.bf16.msra.mxu0 %v2453_v37  ;;  %1307 = vmatpush1.bf16.msra.mxu1 %v2455_v39  ;;  %v468_v37 = vld [vmem:[%s3403_s18 + $0x118] sm:$0xff]  ;;  %v2396_v39 = vcombine.high %v460_v29, %v464_v30 }
 0x109   : > { %1267 = vmatprep.subr.bf16.mxu0 %v2462_v40  ;;  %1308 = vmatprep.subr.bf16.mxu1 %v2464_v42  ;;  %v2393_v40 = vcombine.low %v459_v25, %v463_v26  ;;  %v2395_v42 = vcombine.low %v460_v29, %v464_v30  ;;  %v2404_v46 = vcombine.high %v468_v37, %v472_v38  ;;  %v523_v29 = vld [vmem:[%s3403_s18 + $0x2d0] sm:$0xff] }
 0x10a   : > { %v527_v30 = vld [vmem:[%s3403_s18 + $0x2f0] sm:$0xff] }
 0x10c   : > { %1268 = vmatpush1.bf16.msra.mxu0 %v2461_v45  ;;  %1309 = vmatpush1.bf16.msra.mxu1 %v2463_v47  ;;  %v480_v45 = vld [vmem:[%s3403_s18 + $0x178] sm:$0xff]  ;;  %v2401_v47 = vcombine.low %v467_v33, %v471_v34  ;;  %v2449_v33 = vcombine.low %v515_v21, %v519_v22 }
 0x10d   : > { %1269 = vmatprep.subr.bf16.mxu0 %v2470_v48  ;;  %1310 = vmatprep.subr.bf16.mxu1 %v2472_v50  ;;  %v483_v48 = vld [vmem:[%s3403_s18 + $0x190] sm:$0xff]  ;;  %v2403_v50 = vcombine.low %v468_v37, %v472_v38  ;;  %v2412_v54 = vcombine.high %v476_v44, %v480_v45 }
 0x10e   : > { %v2418_v60 = vcombine.high %v483_v48, %v487_v49  ;;  %v531_v37 = vld [vmem:[%s3403_s18 + $0x310] sm:$0xff] }
 0x10f   : > { %v535_v38 = vld [vmem:[%s3403_s18 + $0x330] sm:$0xff] }
 0x110   : > { %1270 = vmatpush1.bf16.msra.mxu0 %v2469_v53  ;;  %1311 = vmatpush1.bf16.msra.mxu1 %v2471_v55  ;;  %v488_v53 = vld [vmem:[%s3403_s18 + $0x1b8] sm:$0xff] }
 0x111   : > { %1271 = vmatprep.subr.bf16.mxu0 %v2478_v56  ;;  %1312 = vmatprep.subr.bf16.mxu1 %v2480_v59  ;;  %v491_v56 = vld [vmem:[%s3403_s18 + $0x1d0] sm:$0xff]  ;;  %v2411_v59 = vcombine.low %v476_v44, %v480_v45  ;;  %v2420_v63 = vcombine.high %v484_v52, %v488_v53 }
 0x112   : > { %v2426_v4 = vcombine.high %v491_v56, %v495_v57  ;;  %v2425_v8 = vcombine.low %v491_v56, %v495_v57  ;;  %v539_v44 = vld [vmem:[%s3403_s18 + $0x350] sm:$0xff] }
 0x113   : > { %v543_v45 = vld [vmem:[%s3403_s18 + $0x370] sm:$0xff] }
 0x114   : > { %1272 = vmatpush1.bf16.msra.mxu0 %v2477_v62  ;;  %1313 = vmatpush1.bf16.msra.mxu1 %v2479_v0  ;;  %v496_v62 = vld [vmem:[%s3403_s18 + $0x1f8] sm:$0xff]  ;;  %v2417_v0 = vcombine.low %v483_v48, %v487_v49  ;;  %v2465_v48 = vcombine.low %v531_v37, %v535_v38  ;;  %v2473_v56 = vcombine.low %v539_v44, %v543_v45 }
 0x115   : > { %1273 = vmatprep.subr.bf16.mxu0 %v2486_v1  ;;  %1314 = vmatprep.subr.bf16.mxu1 %v2488_v3  ;;  %v499_v1 = vld [vmem:[%s3403_s18 + $0x210] sm:$0xff]  ;;  %v2419_v3 = vcombine.low %v484_v52, %v488_v53 }
 0x116   : > { %v547_v52 = vld [vmem:[%s3403_s18 + $0x390] sm:$0xff] }
 0x117   : > { %v551_v53 = vld [vmem:[%s3403_s18 + $0x3b0] sm:$0xff] }
 0x118   : > { %1274 = vmatpush1.bf16.msra.mxu0 %v2485_v7  ;;  %1315 = vmatpush1.bf16.msra.mxu1 %v2487_v9  ;;  %v2428_v7 = vcombine.high %v492_v61, %v496_v62  ;;  %v2427_v9 = vcombine.low %v492_v61, %v496_v62  ;;  %v555_v61 = vld [vmem:[%s3403_s18 + $0x3d0] sm:$0xff] }
 0x119   : > { %1325 = vmatprep.subr.bf16.mxu0 %v2370_v10  ;;  %1366 = vmatprep.subr.bf16.mxu1 %v2372_v12  ;;  %v2434_v10 = vcombine.high %v499_v1, %v503_v2  ;;  %v507_v12 = vld [vmem:[%s3403_s18 + $0x250] sm:$0xff] }
 0x11a   : > { %v2442_v19 = vcombine.high %v507_v12, %v511_v13  ;;  %v2441_v25 = vcombine.low %v507_v12, %v511_v13  ;;  %v559_v62 = vld [vmem:[%s3403_s18 + $0x3f0] sm:$0xff] }
 0x11b   : > { %1276 = vmatmul.mubr.bf16.vlgmr.msra.gmra.mrb[0].mxu0 %v3502_v14  ;;  %1317 = vmatmul.mubr.bf16.vlgmr.msra.gmra.mrb[0].mxu1 %v3502_v14  ;;  %v2790_v12 = vld [vmem:[%s3424_s20 + $0xc8] sm:$0xff]  }
 0x11c   : > { %1326 = vmatpush1.bf16.msra.mxu0 %v2369_v16  ;;  %1367 = vmatpush1.bf16.msra.mxu1 %v2371_v17  ;;  %v512_v16 = vld [vmem:[%s3403_s18 + $0x278] sm:$0xff]  ;;  %v2433_v17 = vcombine.low %v499_v1, %v503_v2  ;;  %v2481_v1 = vcombine.low %v547_v52, %v551_v53  ;;  %v2791_v13 = vld [vmem:[%s3424_s20 + $0x8] sm:$0xff]  }
 0x11d   : > { %1327 = vmatprep.subr.bf16.mxu0 %v2378_v18  ;;  %1368 = vmatprep.subr.bf16.mxu1 %v2380_v20  ;;  %v2435_v18 = vcombine.low %v500_v5, %v504_v6  ;;  %v2444_v20 = vcombine.high %v508_v15, %v512_v16  ;;  %v2443_v26 = vcombine.low %v508_v15, %v512_v16  ;;  %v2792_v15 = vld [vmem:[%s3424_s20 + $0x88] sm:$0xff]   ;;  %v2793_v16 = vld [vmem:[%s3424_s20 + $0x50] sm:$0xff]  }
 0x11e   : > { %1357 = vmatprep.mubr.bf16.mxu0 %v3457_v58  ;;  %1398 = vmatprep.mubr.bf16.mxu1 %v3457_v58  ;;  %v475_v58 = vld [vmem:[%s3403_s18 + $0x150] sm:$0xff]  ;;  %v2489_v5 = vcombine.low %v555_v61, %v559_v62 }
 0x11f   : > { %v2410_v51 = vcombine.high %v475_v58, %v479_v41  ;;  %v2409_v55 = vcombine.low %v475_v58, %v479_v41  ;;  %v2457_v58 = vcombine.low %v523_v29, %v527_v30 }
 0x120   : > { %1328 = vmatpush1.bf16.msra.mxu0 %v2377_v24  ;;  %1369 = vmatpush1.bf16.msra.mxu1 %v2379_v27  ;;  %v520_v24 = vld [vmem:[%s3403_s18 + $0x2b8] sm:$0xff]  ;;  %v2450_v27 = vcombine.high %v515_v21, %v519_v22  ;;  %v2799_v21 = vld [vmem:[%s3424_s20 + $0x18] sm:$0xff]  }
 0x121   : > { %1329 = vmatprep.subr.bf16.mxu0 %v2386_v28  ;;  %1370 = vmatprep.subr.bf16.mxu1 %v2388_v31  ;;  %v2452_v28 = vcombine.high %v516_v23, %v520_v24  ;;  %v524_v31 = vld [vmem:[%s3403_s18 + $0x2d8] sm:$0xff]  ;;  %v2451_v34 = vcombine.low %v516_v23, %v520_v24  ;;  %v2800_v22 = vld [vmem:[%s3424_s20 + $0x98] sm:$0xff]   ;;  %v2801_v23 = vld [vmem:[%s3424_s20 + $0x60] sm:$0xff]  }
 0x122   : > { %v2802_v24 = vld [vmem:[%s3424_s20 + $0xe0] sm:$0xff]  }
 0x124   : > { %1330 = vmatpush1.bf16.msra.mxu0 %v2385_v32  ;;  %1371 = vmatpush1.bf16.msra.mxu1 %v2387_v35  ;;  %v528_v32 = vld [vmem:[%s3403_s18 + $0x2f8] sm:$0xff]  ;;  %v2458_v35 = vcombine.high %v523_v29, %v527_v30  ;;  %v2807_v29 = vld [vmem:[%s3424_s20 + $0x28] sm:$0xff]  }
 0x125   : > { %1331 = vmatprep.subr.bf16.mxu0 %v2394_v36  ;;  %1372 = vmatprep.subr.bf16.mxu1 %v2396_v39  ;;  %v2460_v36 = vcombine.high %v524_v31, %v528_v32  ;;  %v532_v39 = vld [vmem:[%s3403_s18 + $0x318] sm:$0xff]  ;;  %v2459_v41 = vcombine.low %v524_v31, %v528_v32  ;;  %v2808_v30 = vld [vmem:[%s3424_s20 + $0xa8] sm:$0xff]  }
 0x126   : > { %v2809_v31 = vld [vmem:[%s3424_s20 + $0x70] sm:$0xff]  }
 0x127   : > { %v2810_v32 = vld [vmem:[%s3424_s20 + $0xf0] sm:$0xff]  }
 0x128   : > { %1332 = vmatpush1.bf16.msra.mxu0 %v2393_v40  ;;  %1373 = vmatpush1.bf16.msra.mxu1 %v2395_v42  ;;  %v536_v40 = vld [vmem:[%s3403_s18 + $0x338] sm:$0xff]  ;;  %v2466_v42 = vcombine.high %v531_v37, %v535_v38  ;;  %v2815_v37 = vld [vmem:[%s3424_s20 + $0x38] sm:$0xff]  }
 0x129   : > { %1333 = vmatprep.subr.bf16.mxu0 %v2402_v43  ;;  %1374 = vmatprep.subr.bf16.mxu1 %v2404_v46  ;;  %v2468_v43 = vcombine.high %v532_v39, %v536_v40  ;;  %v540_v46 = vld [vmem:[%s3403_s18 + $0x358] sm:$0xff]  ;;  %v2467_v49 = vcombine.low %v532_v39, %v536_v40  ;;  %v2816_v38 = vld [vmem:[%s3424_s20 + $0xb8] sm:$0xff]   ;;  %v2817_v39 = vld [vmem:[%s3424_s20 + $0x140] sm:$0xff]  }
 0x12a   : > { %v2818_v40 = vld [vmem:[%s3424_s20 + $0x1c0] sm:$0xff]  }
 0x12c   : > { %1334 = vmatpush1.bf16.msra.mxu0 %v2401_v47  ;;  %1375 = vmatpush1.bf16.msra.mxu1 %v2403_v50  ;;  %v544_v47 = vld [vmem:[%s3403_s18 + $0x378] sm:$0xff]  ;;  %v2474_v50 = vcombine.high %v539_v44, %v543_v45 }
 0x12d   : > { %1335 = vmatprep.subr.bf16.mxu0 %v2410_v51  ;;  %1376 = vmatprep.subr.bf16.mxu1 %v2412_v54  ;;  %v2476_v51 = vcombine.high %v540_v46, %v544_v47  ;;  %v548_v54 = vld [vmem:[%s3403_s18 + $0x398] sm:$0xff]  ;;  %v2475_v57 = vcombine.low %v540_v46, %v544_v47 }
 0x130   : > { %1336 = vmatpush1.bf16.msra.mxu0 %v2409_v55  ;;  %1377 = vmatpush1.bf16.msra.mxu1 %v2411_v59  ;;  %v552_v55 = vld [vmem:[%s3403_s18 + $0x3b8] sm:$0xff]  ;;  %v2482_v59 = vcombine.high %v547_v52, %v551_v53 }
 0x131   : > { %1337 = vmatprep.subr.bf16.mxu0 %v2418_v60  ;;  %1378 = vmatprep.subr.bf16.mxu1 %v2420_v63  ;;  %v2484_v60 = vcombine.high %v548_v54, %v552_v55  ;;  %v556_v63 = vld [vmem:[%s3403_s18 + $0x3d8] sm:$0xff]  ;;  %v2483_v2 = vcombine.low %v548_v54, %v552_v55 }
 0x134   : > { %1338 = vmatpush1.bf16.msra.mxu0 %v2417_v0  ;;  %1379 = vmatpush1.bf16.msra.mxu1 %v2419_v3  ;;  %v560_v0 = vld [vmem:[%s3403_s18 + $0x3f8] sm:$0xff]  ;;  %v2490_v3 = vcombine.high %v555_v61, %v559_v62 }
 0x135   : > { %1339 = vmatprep.subr.bf16.mxu0 %v2426_v4  ;;  %1380 = vmatprep.subr.bf16.mxu1 %v2428_v7  ;;  %v2492_v4 = vcombine.high %v556_v63, %v560_v0  ;;  %v2491_v6 = vcombine.low %v556_v63, %v560_v0  ;;  %v2785_v7 = vld [vmem:[%s3424_s20 + $0x40] sm:$0xff]  }
 0x138   : > { %1340 = vmatpush1.bf16.msra.mxu0 %v2425_v8  ;;  %1381 = vmatpush1.bf16.msra.mxu1 %v2427_v9  ;;  %v2786_v8 = vld [vmem:[%s3424_s20 + $0xc0] sm:$0xff]  }
 0x139   : > { %1341 = vmatprep.subr.bf16.mxu0 %v2434_v10  ;;  %1382 = vmatprep.subr.bf16.mxu1 %v2436_v11  ;;  %v2787_v9 = vld [vmem:[%s3424_s20] sm:$0xff]   ;;  %v2789_v11 = vld [vmem:[%s3424_s20 + $0x48] sm:$0xff]  }
 0x13a   : > { %v2788_v10 = vld [vmem:[%s3424_s20 + $0x80] sm:$0xff]  }
 0x13c   : > { %1342 = vmatpush1.bf16.msra.mxu0 %v2433_v17  ;;  %1383 = vmatpush1.bf16.msra.mxu1 %v2435_v18  ;;  %v2794_v17 = vld [vmem:[%s3424_s20 + $0xd0] sm:$0xff]  }
 0x13d   : > { %1343 = vmatprep.subr.bf16.mxu0 %v2442_v19  ;;  %1384 = vmatprep.subr.bf16.mxu1 %v2444_v20  ;;  %v2795_v18 = vld [vmem:[%s3424_s20 + $0x10] sm:$0xff]   ;;  %v2798_v20 = vld [vmem:[%s3424_s20 + $0xd8] sm:$0xff]  }
 0x13e   : > { %v2796_v19 = vld [vmem:[%s3424_s20 + $0x90] sm:$0xff]  }
 0x140   : > { %1344 = vmatpush1.bf16.msra.mxu0 %v2441_v25  ;;  %1385 = vmatpush1.bf16.msra.mxu1 %v2443_v26  ;;  %v2803_v25 = vld [vmem:[%s3424_s20 + $0x20] sm:$0xff]  }
 0x141   : > { %1345 = vmatprep.subr.bf16.mxu0 %v2450_v27  ;;  %1386 = vmatprep.subr.bf16.mxu1 %v2452_v28  ;;  %v2804_v26 = vld [vmem:[%s3424_s20 + $0xa0] sm:$0xff]   ;;  %v2805_v27 = vld [vmem:[%s3424_s20 + $0x68] sm:$0xff]  }
 0x142   : > { %v2806_v28 = vld [vmem:[%s3424_s20 + $0xe8] sm:$0xff]  }
 0x144   : > { %1346 = vmatpush1.bf16.msra.mxu0 %v2449_v33  ;;  %1387 = vmatpush1.bf16.msra.mxu1 %v2451_v34  ;;  %v2811_v33 = vld [vmem:[%s3424_s20 + $0x30] sm:$0xff]  }
 0x145   : > { %1347 = vmatprep.subr.bf16.mxu0 %v2458_v35  ;;  %1388 = vmatprep.subr.bf16.mxu1 %v2460_v36  ;;  %v2812_v34 = vld [vmem:[%s3424_s20 + $0xb0] sm:$0xff]   ;;  %v2813_v35 = vld [vmem:[%s3424_s20 + $0x78] sm:$0xff]  }
 0x146   : > { %v2814_v36 = vld [vmem:[%s3424_s20 + $0xf8] sm:$0xff]  }
 0x148   : > { %1348 = vmatpush1.bf16.msra.mxu0 %v2457_v58  ;;  %1389 = vmatpush1.bf16.msra.mxu1 %v2459_v41  ;;  %v563_v58 = vlaneseq }
 0x149   : > { %1349 = vmatprep.subr.bf16.mxu0 %v2466_v42  ;;  %1390 = vmatprep.subr.bf16.mxu1 %v2468_v43  ;;  %v3606_v43 = vld [vmem:[%s366_s14] sm:$0xff] }
 0x14a   : > { %v3601_v41 = vshrl.u32 %v563_v58, 7 }
 0x14c   : > { %1350 = vmatpush1.bf16.msra.mxu0 %v2465_v48  ;;  %1391 = vmatpush1.bf16.msra.mxu1 %v2467_v49  ;;  %v565_v42 = vsub.s32 0, %v3601_v41  ;;  %v573_v44 = vsub.s32 2, %v3601_v41  ;;  %v569_v45 = vsub.s32 1, %v3601_v41  ;;  %v577_v46 = vsub.s32 3, %v3601_v41 }
 0x14d   : > { %1351 = vmatprep.subr.bf16.mxu0 %v2474_v50  ;;  %1392 = vmatprep.subr.bf16.mxu1 %v2476_v51  ;;  %v593_v58 = vsub.s32 7, %v3601_v41 }
 0x14e   : > { %v566_v47 = vrot.slane %v3606_v43, %v565_v42  ;;  %v574_v48 = vrot.slane %v3606_v43, %v573_v44  ;;  %v570_v49 = vrot.slane %v3606_v43, %v569_v45  ;;  %v578_v50 = vrot.slane %v3606_v43, %v577_v46 }
 0x14f   : > { %v594_v46 = vrot.slane %v3606_v43, %v593_v58 }
 0x150   : > { %1352 = vmatpush1.bf16.msra.mxu0 %v2473_v56  ;;  %1393 = vmatpush1.bf16.msra.mxu1 %v2475_v57 }
 0x151   : > { %1353 = vmatprep.subr.bf16.mxu0 %v2482_v59  ;;  %1394 = vmatprep.subr.bf16.mxu1 %v2484_v60 }
 0x154   : > { %1354 = vmatpush1.bf16.msra.mxu0 %v2481_v1  ;;  %1395 = vmatpush1.bf16.msra.mxu1 %v2483_v2 }
 0x155   : > { %1355 = vmatprep.subr.bf16.mxu0 %v2490_v3  ;;  %1396 = vmatprep.subr.bf16.mxu1 %v2492_v4 }
 0x158   : > { %1356 = vmatpush1.bf16.msra.mxu0 %v2489_v5  ;;  %1397 = vmatpush1.bf16.msra.mxu1 %v2491_v6 }
 0x159   : > { %2567 = vmatprep.subr.bf16.mxu0 %v2785_v7  ;;  %2589 = vmatprep.subr.bf16.mxu1 %v2786_v8  ;;  %v2819_v7 = vld [vmem:[%s3424_s20 + $0x100] sm:$0xff]  }
 0x15b   : > { %1358 = vmatmul.mubr.bf16.vlgmr.msra.gmra.mrb[4].mxu0 %v3502_v14  ;;  %1399 = vmatmul.mubr.bf16.vlgmr.msra.gmra.mrb[4].mxu1 %v3502_v14  ;;  %v2797_v14 = vld [vmem:[%s3424_s20 + $0x58] sm:$0xff]  }
 0x15c   : > { %2568 = vmatpush3.bf16.msra.mxu0 %v2787_v9  ;;  %2590 = vmatpush3.bf16.msra.mxu1 %v2788_v10  ;;  %v2820_v9 = vld [vmem:[%s3424_s20 + $0x180] sm:$0xff]   ;;  %v2821_v10 = vld [vmem:[%s3424_s20 + $0x148] sm:$0xff]  }
 0x15d   : > { %2569 = vmatprep.subr.bf16.mxu0 %v2789_v11  ;;  %2591 = vmatprep.subr.bf16.mxu1 %v2790_v12  ;;  %v2822_v11 = vld [vmem:[%s3424_s20 + $0x1c8] sm:$0xff]  }
 0x15e   : > { %v2823_v12 = vld [vmem:[%s3424_s20 + $0x108] sm:$0xff]  }
 0x160   : > { %2570 = vmatpush3.bf16.msra.mxu0 %v2791_v13  ;;  %2592 = vmatpush3.bf16.msra.mxu1 %v2792_v15  ;;  %v2824_v13 = vld [vmem:[%s3424_s20 + $0x188] sm:$0xff]   ;;  %v2825_v15 = vld [vmem:[%s3424_s20 + $0x150] sm:$0xff]  }
 0x161   : > { %2571 = vmatprep.subr.bf16.mxu0 %v2793_v16  ;;  %2593 = vmatprep.subr.bf16.mxu1 %v2794_v17  ;;  %v2826_v16 = vld [vmem:[%s3424_s20 + $0x1d0] sm:$0xff]  }
 0x162   : > { %v2827_v17 = vld [vmem:[%s3424_s20 + $0x110] sm:$0xff]  }
 0x164   : > { %2572 = vmatpush3.bf16.msra.mxu0 %v2795_v18  ;;  %2594 = vmatpush3.bf16.msra.mxu1 %v2796_v19  ;;  %v2828_v18 = vld [vmem:[%s3424_s20 + $0x190] sm:$0xff]   ;;  %v2829_v19 = vld [vmem:[%s3424_s20 + $0x158] sm:$0xff]  }
 0x165   : > { %2573 = vmatprep.subr.bf16.mxu0 %v2797_v14  ;;  %2595 = vmatprep.subr.bf16.mxu1 %v2798_v20  ;;  %v2830_v14 = vld [vmem:[%s3424_s20 + $0x1d8] sm:$0xff]  }
 0x166   : > { %v2831_v20 = vld [vmem:[%s3424_s20 + $0x118] sm:$0xff]  }
 0x168   : > { %2574 = vmatpush3.bf16.msra.mxu0 %v2799_v21  ;;  %2596 = vmatpush3.bf16.msra.mxu1 %v2800_v22  ;;  %v2832_v21 = vld [vmem:[%s3424_s20 + $0x198] sm:$0xff]   ;;  %v2833_v22 = vld [vmem:[%s3424_s20 + $0x160] sm:$0xff]  }
 0x169   : > { %2575 = vmatprep.subr.bf16.mxu0 %v2801_v23  ;;  %2597 = vmatprep.subr.bf16.mxu1 %v2802_v24  ;;  %v2834_v23 = vld [vmem:[%s3424_s20 + $0x1e0] sm:$0xff]  }
 0x16a   : > { %v2835_v24 = vld [vmem:[%s3424_s20 + $0x120] sm:$0xff]  }
 0x16c   : > { %2576 = vmatpush3.bf16.msra.mxu0 %v2803_v25  ;;  %2598 = vmatpush3.bf16.msra.mxu1 %v2804_v26  ;;  %v2836_v25 = vld [vmem:[%s3424_s20 + $0x1a0] sm:$0xff]   ;;  %v2837_v26 = vld [vmem:[%s3424_s20 + $0x168] sm:$0xff]  }
 0x16d   : > { %2577 = vmatprep.subr.bf16.mxu0 %v2805_v27  ;;  %2599 = vmatprep.subr.bf16.mxu1 %v2806_v28  ;;  %v2838_v27 = vld [vmem:[%s3424_s20 + $0x1e8] sm:$0xff]  }
 0x16e   : > { %v2839_v28 = vld [vmem:[%s3424_s20 + $0x128] sm:$0xff]  }
 0x170   : > { %2578 = vmatpush3.bf16.msra.mxu0 %v2807_v29  ;;  %2600 = vmatpush3.bf16.msra.mxu1 %v2808_v30  ;;  %v2840_v29 = vld [vmem:[%s3424_s20 + $0x1a8] sm:$0xff]   ;;  %v2841_v30 = vld [vmem:[%s3424_s20 + $0x170] sm:$0xff]  }
 0x171   : > { %2579 = vmatprep.subr.bf16.mxu0 %v2809_v31  ;;  %2601 = vmatprep.subr.bf16.mxu1 %v2810_v32  ;;  %v2842_v31 = vld [vmem:[%s3424_s20 + $0x1f0] sm:$0xff]  }
 0x172   : > { %v2843_v32 = vld [vmem:[%s3424_s20 + $0x130] sm:$0xff]  }
 0x174   : > { %2580 = vmatpush3.bf16.msra.mxu0 %v2811_v33  ;;  %2602 = vmatpush3.bf16.msra.mxu1 %v2812_v34  ;;  %v2844_v33 = vld [vmem:[%s3424_s20 + $0x1b0] sm:$0xff]   ;;  %v2845_v34 = vld [vmem:[%s3424_s20 + $0x178] sm:$0xff]  }
 0x175   : > { %2581 = vmatprep.subr.bf16.mxu0 %v2813_v35  ;;  %2603 = vmatprep.subr.bf16.mxu1 %v2814_v36  ;;  %v2846_v35 = vld [vmem:[%s3424_s20 + $0x1f8] sm:$0xff]  }
 0x176   : > { %v2847_v36 = vld [vmem:[%s3424_s20 + $0x138] sm:$0xff]  }
 0x178   : > { %2582 = vmatpush3.bf16.msra.mxu0 %v2815_v37  ;;  %2604 = vmatpush3.bf16.msra.mxu1 %v2816_v38  ;;  %v2848_v37 = vld [vmem:[%s3424_s20 + $0x1b8] sm:$0xff]   ;;  %v581_v38 = vsub.s32 4, %v3601_v41 }
 0x179   : > { %2611 = vmatprep.subr.bf16.mxu0 %v2817_v39  ;;  %2633 = vmatprep.subr.bf16.mxu1 %v2818_v40  ;;  %v589_v39 = vsub.s32 6, %v3601_v41  ;;  %v585_v40 = vsub.s32 5, %v3601_v41 }
 0x17a   : > { %v582_v42 = vrot.slane %v3606_v43, %v581_v38 }
 0x17b   : > { %v590_v44 = vrot.slane %v3606_v43, %v589_v39  ;;  %v586_v45 = vrot.slane %v3606_v43, %v585_v40 }
 0x1ee   : > { %v1277_v51 = vpop.f32.mrb[0].mxu0  ;;  %v1318_v53 = vpop.f32.mrb[0].mxu1 }
 0x1ef   : > { %v1278_v52 = vadd.f32 %v1277_v51, %v566_v47  ;;  %v1279_v54 = vpop.f32.mrb[1].mxu0  ;;  %v1319_v55 = vadd.f32 %v1318_v53, %v574_v48  ;;  %v1320_v57 = vpop.f32.mrb[1].mxu1 }
 0x1f0   : > { %v1280_v56 = vadd.f32 %v1279_v54, %v570_v49  ;;  %v1281_v59 = vpop.f32.mrb[2].mxu0  ;;  %v1321_v61 = vadd.f32 %v1320_v57, %v578_v50  ;;  %v1322_v62 = vpop.f32.mrb[2].mxu1 }
 0x1f1   : > { %v1407_v60 = vmax.f32 %v1278_v52, 0.0  ;;  %v1282_v63 = vpop.f32.mrb[3].mxu0  ;;  %v1409_v0 = vmax.f32 %v1319_v55, 0.0  ;;  %v1323_v2 = vpop.f32.mrb[3].mxu1 }
 0x1f2   : > { %v1408_v1 = vmax.f32 %v1280_v56, 0.0  ;;  %v1410_v4 = vmax.f32 %v1321_v61, 0.0 }
 0x1f3   : > { %v1543_v3 = vpack.c.bf16 %v1407_v60, %v1407_v60  ;;  %v1545_v5 = vpack.c.bf16 %v1409_v0, %v1409_v0 }
 0x1f4   : > { %v1544_v6 = vpack.c.bf16 %v1408_v1, %v1408_v1  ;;  %v1546_v8 = vpack.c.bf16 %v1410_v4, %v1410_v4 }
 0x1f6   : > { %1967 = vmatprep.mubr.bf16.mxu0 %v1544_v6  ;;  %2007 = vmatprep.mubr.bf16.mxu1 %v1546_v8 }
 0x1f7   : > { %1968 = vmatmul.mubr.bf16.vlgmr.msra.gmra.mrb[8].mxu0 %v1543_v3  ;;  %2008 = vmatmul.mubr.bf16.vlgmr.msra.gmra.mrb[8].mxu1 %v1545_v5 }
 0x1f8   : > { %2612 = vmatpush3.bf16.msra.mxu0 %v2819_v7  ;;  %2634 = vmatpush3.bf16.msra.mxu1 %v2820_v9 }
 0x1f9   : > { %2613 = vmatprep.subr.bf16.mxu0 %v2821_v10  ;;  %2635 = vmatprep.subr.bf16.mxu1 %v2822_v11 }
 0x1fc   : > { %2614 = vmatpush3.bf16.msra.mxu0 %v2823_v12  ;;  %2636 = vmatpush3.bf16.msra.mxu1 %v2824_v13 }
 0x1fd   : > { %2615 = vmatprep.subr.bf16.mxu0 %v2825_v15  ;;  %2637 = vmatprep.subr.bf16.mxu1 %v2826_v16 }
 0x200   : > { %2616 = vmatpush3.bf16.msra.mxu0 %v2827_v17  ;;  %2638 = vmatpush3.bf16.msra.mxu1 %v2828_v18 }
 0x201   : > { %2617 = vmatprep.subr.bf16.mxu0 %v2829_v19  ;;  %2639 = vmatprep.subr.bf16.mxu1 %v2830_v14 }
 0x204   : > { %2618 = vmatpush3.bf16.msra.mxu0 %v2831_v20  ;;  %2640 = vmatpush3.bf16.msra.mxu1 %v2832_v21 }
 0x205   : > { %2619 = vmatprep.subr.bf16.mxu0 %v2833_v22  ;;  %2641 = vmatprep.subr.bf16.mxu1 %v2834_v23 }
 0x208   : > { %2620 = vmatpush3.bf16.msra.mxu0 %v2835_v24  ;;  %2642 = vmatpush3.bf16.msra.mxu1 %v2836_v25  ;;  %v2095_v24 = vld [vmem:[#allocation2] sm:$0xff] }
 0x209   : > { %2621 = vmatprep.subr.bf16.mxu0 %v2837_v26  ;;  %2643 = vmatprep.subr.bf16.mxu1 %v2838_v27  ;;  %v2113_v27 = vld [vmem:[#allocation11] sm:$0xff] (!%p2557_p3) }
 0x20c   : > { %2622 = vmatpush3.bf16.msra.mxu0 %v2839_v28  ;;  %2644 = vmatpush3.bf16.msra.mxu1 %v2840_v29  ;;  %v2114_v28 = vld [vmem:[#allocation11 + $0x8] sm:$0xff] (!%p2557_p3) }
 0x20d   : > { %2623 = vmatprep.subr.bf16.mxu0 %v2841_v30  ;;  %2645 = vmatprep.subr.bf16.mxu1 %v2842_v31  ;;  %v3127_v30 = vmov (!%p2557_p3), 0.0|0.0   ;;  %v2666_v31 = vpack.c.bf16 (!%p2557_p3), %v2114_v28, %v2113_v27 }
 0x210   : > { %2624 = vmatpush3.bf16.msra.mxu0 %v2843_v32  ;;  %2646 = vmatpush3.bf16.msra.mxu1 %v2844_v33  ;;  %v3129_v32 = vmov (!%p2557_p3), 0.0   ;;  %v2558_v33 = vld [vmem:[#allocation9] ss:$0 sm:$0xff] (!%p2557_p3) }
 0x211   : > { %2625 = vmatprep.subr.bf16.mxu0 %v2845_v34  ;;  %2647 = vmatprep.subr.bf16.mxu1 %v2846_v35 }
 0x214   : > { %2626 = vmatpush3.bf16.msra.mxu0 %v2847_v36  ;;  %2648 = vmatpush3.bf16.msra.mxu1 %v2848_v37  ;;  %v2559_v36 = vld [vmem:[#allocation12] ss:$0 sm:$0xff] (!%p2557_p3) }
 0x215   : > { %2665 = vmatprep.subr.bf16.mxu0 (!%p2557_p3), %v3127_v30 }
 0x22e   : > { %v1359_v47 = vpop.f32.mrb[4].mxu0  ;;  %v1400_v49 = vpop.f32.mrb[4].mxu1 }
 0x22f   : > { %v1360_v48 = vadd.f32 %v1359_v47, %v582_v42  ;;  %v1361_v50 = vpop.f32.mrb[5].mxu0  ;;  %v1401_v51 = vadd.f32 %v1400_v49, %v590_v44  ;;  %v1402_v53 = vpop.f32.mrb[5].mxu1 }
 0x230   : > { %v1362_v52 = vadd.f32 %v1361_v50, %v586_v45  ;;  %v1363_v54 = vpop.f32.mrb[6].mxu0  ;;  %v1403_v56 = vadd.f32 %v1402_v53, %v594_v46  ;;  %v1404_v57 = vpop.f32.mrb[6].mxu1 }
 0x231   : > { %v1411_v55 = vmax.f32 %v1360_v48, 0.0  ;;  %v1364_v41 = vpop.f32.mrb[7].mxu0  ;;  %v1413_v59 = vmax.f32 %v1401_v51, 0.0  ;;  %v1405_v61 = vpop.f32.mrb[7].mxu1 }
 0x232   : > { %v1412_v60 = vmax.f32 %v1362_v52, 0.0  ;;  %v1414_v62 = vmax.f32 %v1403_v56, 0.0 }
 0x233   : > { %v1549_v63 = vpack.c.bf16 %v1413_v59, %v1413_v59  ;;  %v1547_v1 = vpack.c.bf16 %v1411_v55, %v1411_v55 }
 0x234   : > { %v1548_v0 = vpack.c.bf16 %v1412_v60, %v1412_v60  ;;  %v1550_v43 = vpack.c.bf16 %v1414_v62, %v1414_v62 }
 0x236   : > { %2047 = vmatprep.mubr.bf16.mxu0 %v1548_v0  ;;  %2087 = vmatprep.mubr.bf16.mxu1 %v1550_v43 }
 0x237   : > { %2048 = vmatmul.mubr.bf16.vlgmr.msra.gmra.mrb[12].mxu0 %v1547_v1  ;;  %2088 = vmatmul.mubr.bf16.vlgmr.msra.gmra.mrb[12].mxu1 %v1549_v63 }
 0x238   : > { %2662 = vmatprep.mubr.msk.f32.mxu0 (!%p2557_p3), %vm3128_vm2, %v3129_v32  ;;  %2667 = vmatpush3.bf16.msra.mxu0 (!%p2557_p3), %v2666_v31 }
 0x2ca   : > { %v2583_v2 = vpop.f32.mrb[8].mxu0  ;;  %v2605_v3 = vpop.f32.mrb[8].mxu1 }
 0x2cb   : > { %v2584_v4 = vpop.f32.mrb[9].mxu0  ;;  %v2606_v6 = vpop.f32.mrb[9].mxu1 }
 0x2cc   : > { %v2585_v5 = vadd.f32 %v2584_v4, %v2583_v2  ;;  %v2586_v7 = vpop.f32.mrb[10].mxu0  ;;  %v2607_v8 = vadd.f32 %v2606_v6, %v2605_v3  ;;  %v2608_v9 = vpop.f32.mrb[10].mxu1 }
 0x2cd   : > { %v2587_v10 = vpop.f32.mrb[11].mxu0  ;;  %v2609_v11 = vpop.f32.mrb[11].mxu1 }
 0x2ce   : > { %v2010_v12 = vadd.f32 %v2607_v8, %v2585_v5 }
 0x30a   : > { %v2627_v13 = vpop.f32.mrb[12].mxu0  ;;  %v2649_v15 = vpop.f32.mrb[12].mxu1 }
 0x30b   : > { %v2628_v16 = vpop.f32.mrb[13].mxu0  ;;  %v2650_v18 = vpop.f32.mrb[13].mxu1 }
 0x30c   : > { %v2629_v17 = vadd.f32 %v2628_v16, %v2627_v13  ;;  %v2630_v19 = vpop.f32.mrb[14].mxu0  ;;  %v2651_v14 = vadd.f32 %v2650_v18, %v2649_v15  ;;  %v2652_v20 = vpop.f32.mrb[14].mxu1 }
 0x30d   : > { %v2631_v21 = vpop.f32.mrb[15].mxu0  ;;  %v2653_v23 = vpop.f32.mrb[15].mxu1 }
 0x30e   : > { %v2050_v22 = vadd.f32 %v2629_v17, %v2010_v12  ;;  %2102 = sbr.rel (%p2557_p3) target bundleno = 1015 (0x3f7), region = 80 }
 0x310   : > { %v2090_v25 = vadd.f32 %v2651_v14, %v2050_v22 }
 0x312   : > { %v2096_v26 = vadd.f32 %v2095_v24, %v2090_v25 }
 0x314   : > { %2098 = vst.msk [vmem:[#allocation2] sm:$0xff] %vm2097_vm1, %v2096_v26 }
 0x31b   : > { %v2103_v29 = vld [vmem:[#allocation2] sm:$0xff] }
 0x31c   : > { %v2111_v34 = vadd.f32 %v2558_v33, %v2103_v29 }
 0x31e   : > { %v2112_v35 = vmax.f32 %v2111_v34, 0.0 }
 0x320   : > { %2663 = vmatmul.mubr.msk.f32.vlgmr.msra.gmra.mrb[0].mxu0 %vm2097_vm1, %v2112_v35 }
 0x3f3   : > { %v2191_v37 = vpop.f32.mrb[0].mxu0 }
 0x3f4   : > { %v2192_v38 = vadd.f32 %v2559_v36, %v2191_v37  ;;  %v2664_v39 = vpop.f32.mrb[1].mxu0 }
 0x3f6   : > { %2196 = vst.msk [vmem:[#allocation14] sm:$0xff] %vm2195_vm3, %v2192_v38 }
 0x3f7 PF: > { %p2721_p0 = scmp.eq.s32.totalorder %s3200_s30, 3  ;;  %s3130_s27 = smov [#allocation14]  }
 0x3f8   : > { %s2206_s23 = sshll.u32 %s3130_s27, 4  ;;  %s2207_s23 = int_to_ptr.vmem [resolvable:$true] %s2206_s23 }
 0x3f9   : > { %s3021_s12 = scalar_lea.vmem %s2207_s23, 128  ;;  %p3028_p9 = scmp.lt.s32.totalorder %s2207_s23, %s2207_s23 }
 0x3fa   : > { %p3022_p7 = scmp.ne.s32.totalorder %s2207_s23, %s3021_s12  ;;  %p3029_p11 = scmp.lt.s32.totalorder %s3021_s12, %s3021_s12 }
 0x3fc   : > { %p3023_p8 = pnand %p3022_p7, %p2721_p0  ;;  %p3030_p13 = por %p3029_p11, %p3028_p9 }
 0x3fe   : > { %p3024_p5 = pneg %p3023_p8 }
 0x400   : > { %p3031_p12 = pnand %p3030_p13, %p3024_p5 }
 0x402   : > { %3034 = shalt.err (!%p3031_p12)
}
 0x403   : > { %s3747_s24 = sld [smem:[#allocation26_spill]] }
 0x409   : > { %s3748_s16 = smov %s3747_s24  ;;  %s3035_s17 = scalar_lea.hbm %s3747_s24, 128 }
 0x40a   : > { %p3036_p2 = scmp.ne.s32.totalorder %s3748_s16, %s3035_s17  ;;  %p3041_p4 = scmp.lt.u32.totalorder %s3035_s17, %s3748_s16 }
 0x40c   : > { %p3037_p6 = pnand %p3036_p2, %p2721_p0 }
 0x40e   : > { %p3038_p1 = pneg %p3037_p6 }
 0x410   : > { %p3043_p10 = pnand %p3041_p4, %p3038_p1 }
 0x412   : > { %3046 = shalt.err (!%p3043_p10)
}
 0x413   : > { %2689 = dma.vmem_to_hbm [thread:$0]  (%p2721_p0), %s2207_s23, 128, %s3748_s16, [#allocation5]  }
 0x414   : > { %3088 = dma.done.wait (%p2721_p0), [#allocation5], 128  }
 0x415   : > { %3090 = vsyncadd (%p2721_p0), [#allocation5], 4294967168 }
 0x416 PF: > { %s3749_s7 = sld [smem:[#allocation20_spill]]  ;;  %s3750_s18 = sld [smem:[#allocation22_spill]] }
 0x417   : > { %s3751_s9 = sld [smem:[#allocation21_spill]]  ;;  %s3752_s24 = smov %s3097_s25 }
 0x418   : > { %s3753_s25 = smov %s3101_s26  ;;  %s3755_s27 = smov %s3109_s28 }
 0x41c   : > { %s24_s29 = sadd.s32 1, %s3749_s7   ;;  %s3754_s26 = smov %s3750_s18 }
 0x41d   : > { %p21_p3 = scmp.ge.s32.totalorder %s24_s29, 6   ;;  %s3756_s28 = smov %s3751_s9 }
 0x41f   :  { %23 = sbr.rel (!%p21_p3) target bundleno = 13 (0xd), region = 126 }
 0x426   :  { %2219 = vsyncpa [#allocation4], 1 }
 0x427   :  { %2221 = vsyncpa [#allocation4 + $0x1], 1 }
 0x428   :  { %2222 = vsyncpa [#allocation7], 1 }
 0x429   :  { %2224 = vsyncpa [#allocation7 + $0x1], 1 }
 0x42a   :  { %2225 = vsyncpa [#allocation10], 1 }
 0x42b   :  { %2226 = vsyncpa [#allocation13], 1 }
 0x42c   :  { %2227 = vsyncpa [#allocation5], 1 }
 0x42d   :  { %2229 = vsyncpa [#allocation5 + $0x1], 1 }

</bundles_post_ra>
